<compile_context>
chip_gen: v5e
topology: v5e:2x2
jax: 0.10.0
libtpu: 0.0.40
codegen_flags: <defaults>
</compile_context>

<pallas_src>
import functools
import math

import jax
import jax.numpy as jnp
from jax import lax
from jax.experimental import pallas as pl
from jax.experimental.pallas import tpu as pltpu


# ----------------------------- helpers ---------------------------------------
def _nbytes(shape, dtype):
    n = 1
    for s in shape:
        n *= int(s)
    return n * jnp.dtype(dtype).itemsize


def _pick_tblk(T, Bb, H, max_tblk=128):
    """Time-block size: fill the MXU M dim (Bb*tblk ~ 256) under a VMEM cap."""
    if T <= 8:
        return T
    target = pl.cdiv(256, max(Bb, 1))                     # MXU M-dim target
    cap = (2 * 1024 * 1024) // max(1, Bb * 4 * H * 4)     # staged gx block <= ~2 MiB f32
    tblk = max(8, min(max_tblk, target, max(cap, 8), T))
    tblk = max(8, (tblk // 8) * 8)                        # 8-aligned for clean reshapes/tiles
    return min(tblk, T)


def _sigmoid(x):
    # tanh-based sigmoid: one EUP op per gate instead of exp + divide.
    return 0.5 * (jnp.tanh(0.5 * x) + 1.0)


def _lstm_cell_step(gates, c):
    """PyTorch gate order i, f, g, o. Elementwise math + state in f32."""
    # TODO(synk): for production sizes pad H to a multiple of 128 so gate slices
    # are whole-vreg lane views (no partial-lane ops).
    H = c.shape[-1]
    i_g = _sigmoid(gates[:, 0 * H:1 * H])
    f_g = _sigmoid(gates[:, 1 * H:2 * H])
    g_g = jnp.tanh(gates[:, 2 * H:3 * H])
    o_g = _sigmoid(gates[:, 3 * H:4 * H])
    c_new = f_g * c + i_g * g_g
    h_new = o_g * jnp.tanh(c_new)
    return h_new, c_new


# --------------------------- fused LSTM + head kernel -------------------------
def _lstm_fused_kernel(x_ref, w_ih0_ref, w_ihr_ref, w_hh_ref, b_ref,
                       w_out_ref, b_out_ref, out_ref,
                       h_st, c_st, hs_sc, gx_sc,
                       *, tblk, n_layers, seq_len, mxu_dtype, unroll_limit):
    tb = pl.program_id(1)

    @pl.when(tb == 0)
    def _():
        h_st[...] = jnp.zeros_like(h_st)
        c_st[...] = jnp.zeros_like(c_st)

    Bb = x_ref.shape[1]
    H = w_hh_ref.shape[1]
    G4 = 4 * H
    needs_mask = (seq_len % tblk) != 0
    t0 = tb * tblk

    for l in range(n_layers):
        # -- hoisted input projection: one (tblk*Bb, K) x (K, 4H) matmul / layer / block --
        if l == 0:
            inp = x_ref[...]                           # (tblk, Bb, I), already mxu_dtype
            w_ih_t = w_ih0_ref[...]                    # (I, 4H)
        else:
            inp = hs_sc[...].astype(mxu_dtype)         # (tblk, Bb, H)
            w_ih_t = w_ihr_ref[l - 1]                  # (H, 4H)
        kdim = inp.shape[-1]
        gx_sc[...] = (
            jnp.dot(inp.reshape(tblk * Bb, kdim), w_ih_t,
                    preferred_element_type=jnp.float32) + b_ref[l]
        ).reshape(tblk, Bb, G4)

        w_hh_t = w_hh_ref[l]                           # (H, 4H)
        store_hs = (l < n_layers - 1)                  # last layer's hs never consumed

        def step(i, h, c, _w_hh_t=w_hh_t, _store=store_hs):
            gates = gx_sc[i] + jnp.dot(h.astype(mxu_dtype), _w_hh_t,
                                       preferred_element_type=jnp.float32)
            h_new, c_new = _lstm_cell_step(gates, c)
            if needs_mask:
                valid = (t0 + i) < seq_len
                h_new = jnp.where(valid, h_new, h)
                c_new = jnp.where(valid, c_new, c)
            if _store:
                hs_sc[i] = h_new
            return h_new, c_new

        if tblk <= unroll_limit:
            h, c = h_st[l], c_st[l]
            for i in range(tblk):                      # fully unrolled (small, static)
                h, c = step(i, h, c)
        else:
            h, c = lax.fori_loop(0, tblk, lambda i, hc: step(i, *hc),
                                 (h_st[l], c_st[l]), unroll=8)
        h_st[l] = h
        c_st[l] = c

    # Fused output Linear on the final hidden state only; single HBM writeback.
    @pl.when(tb == pl.num_programs(1) - 1)
    def _():
        h_last = h_st[n_layers - 1]
        out_ref[...] = (
            jnp.dot(h_last.astype(mxu_dtype), w_out_ref[...],
                    preferred_element_type=jnp.float32) + b_out_ref[...]
        ).astype(out_ref.dtype)


# ------------------------------- wrapper --------------------------------------
def lstm_model_forward(x, params, *, mxu_dtype=jnp.float32, max_tblk=128,
                       batch_block=None, unroll_limit=32):
    """x: (B, T, I) f32. Returns (B, O) f32 logits. Eval semantics (no dropout)."""
    layers = params["rnn"]
    L = len(layers)
    B, T, I = x.shape
    H = layers[0][1].shape[1]
    O = params["out_w"].shape[0]

    Bb = B if batch_block is None else int(batch_block)
    if Bb <= 0 or B % Bb != 0:
        Bb = B
    n_bblk = B // Bb

    tblk = _pick_tblk(T, Bb, H, max_tblk)
    n_tblk = pl.cdiv(T, tblk)
    T_pad = n_tblk * tblk

    # Time-major once at the model boundary; pre-cast activations to the MXU dtype.
    x_tm = jnp.transpose(x, (1, 0, 2)).astype(mxu_dtype)            # (T, B, I)
    if T_pad != T:
        x_tm = jnp.pad(x_tm, ((0, T_pad - T), (0, 0), (0, 0)))

    w_ih0_t = layers[0][0].T.astype(mxu_dtype)                      # (I, 4H)
    if L > 1:
        w_ihr_t = jnp.stack(
            [w_ih.T for (w_ih, _, _, _) in layers[1:]]).astype(mxu_dtype)   # (L-1, H, 4H)
    else:
        w_ihr_t = jnp.zeros((1, H, 4 * H), mxu_dtype)               # unused dummy
    w_hh_t = jnp.stack(
        [w_hh.T for (_, w_hh, _, _) in layers]).astype(mxu_dtype)   # (L, H, 4H)
    bias = jnp.stack([(b_ih + b_hh).reshape(1, 4 * H)
                      for (_, _, b_ih, b_hh) in layers]).astype(jnp.float32)  # (L, 1, 4H)
    w_out_t = params["out_w"].T.astype(mxu_dtype)                   # (H, O)
    b_out = params["out_b"].astype(jnp.float32).reshape(1, O)

    kernel = functools.partial(_lstm_fused_kernel, tblk=tblk, n_layers=L,
                               seq_len=T, mxu_dtype=mxu_dtype,
                               unroll_limit=unroll_limit)

    # Explicit VMEM budget (blocks + weights + scratch), clamped for v7x's 64 MiB.
    wbytes = (_nbytes((I, 4 * H), mxu_dtype)
              + _nbytes((max(L - 1, 1), H, 4 * H), mxu_dtype)
              + _nbytes((L, H, 4 * H), mxu_dtype)
              + _nbytes((L, 1, 4 * H), jnp.float32)
              + _nbytes((H, O), mxu_dtype) + _nbytes((1, O), jnp.float32))
    est = (2 * _nbytes((tblk, Bb, I), mxu_dtype)            # double-buffered x blocks
           + 2 * _nbytes((Bb, O), jnp.float32)
           + 2 * wbytes                                      # worst case: double-buffered weights
           + 2 * _nbytes((L, Bb, H), jnp.float32)            # h/c state scratch
           + _nbytes((tblk, Bb, H), jnp.float32)             # hidden-seq scratch
           + _nbytes((tblk, Bb, 4 * H), jnp.float32))        # staged gate scratch
    vmem_limit = int(min(max(2 * est, 16 << 20), 48 << 20))

    def _const_spec(shape, single_buffer):
        idx = lambda bb, tb: (0,) * len(shape)
        if single_buffer:
            return pl.BlockSpec(shape, idx, pipeline_mode=pl.Buffered(1))
        return pl.BlockSpec(shape, idx)

    def _run(single_buffer):
        return pl.pallas_call(
            kernel,
            out_shape=jax.ShapeDtypeStruct((B, O), jnp.float32),
            grid_spec=pltpu.PrefetchScalarGridSpec(
                num_scalar_prefetch=0,
                grid=(n_bblk, n_tblk),
                in_specs=[
                    pl.BlockSpec((tblk, Bb, I), lambda bb, tb: (tb, bb, 0)),
                    _const_spec((I, 4 * H), single_buffer),
                    _const_spec((max(L - 1, 1), H, 4 * H), single_buffer),
                    _const_spec((L, H, 4 * H), single_buffer),
                    _const_spec((L, 1, 4 * H), single_buffer),
                    _const_spec((H, O), single_buffer),
                    _const_spec((1, O), single_buffer),
                ],
                out_specs=pl.BlockSpec((Bb, O), lambda bb, tb: (bb, 0)),
                scratch_shapes=[
                    pltpu.VMEM((L, Bb, H), jnp.float32),        # per-layer h state
                    pltpu.VMEM((L, Bb, H), jnp.float32),        # per-layer c state
                    pltpu.VMEM((tblk, Bb, H), jnp.float32),     # hidden-seq block (layer l -> l+1)
                    pltpu.VMEM((tblk, Bb, 4 * H), jnp.float32),  # staged gates gx
                ],
            ),
            compiler_params=pltpu.CompilerParams(
                dimension_semantics=("parallel", "arbitrary"),
                vmem_limit_bytes=vmem_limit),
        )(x_tm, w_ih0_t, w_ihr_t, w_hh_t, bias, w_out_t, b_out)

    if not hasattr(pl, "Buffered"):
        return _run(False)
    try:
        return _run(True)
    except Exception as e:
        # Narrow fallback: only retry when the failure is about buffering /
        # pipeline_mode support; anything else (e.g. VMEM OOM) is re-raised.
        msg = str(e).lower()
        if ("buffer" in msg) or ("pipeline" in msg):
            return _run(False)
        raise


# --------------------------- deterministic params -----------------------------
def init_params(key, input_dim, hidden_dim, num_layers, output_dim):
    k = 1.0 / math.sqrt(hidden_dim)
    params = {"rnn": []}
    for layer in range(num_layers):
        in_dim = input_dim if layer == 0 else hidden_dim
        key, k1, k2, k3, k4 = jax.random.split(key, 5)
        w_ih = jax.random.uniform(k1, (4 * hidden_dim, in_dim), jnp.float32, -k, k)
        w_hh = jax.random.uniform(k2, (4 * hidden_dim, hidden_dim), jnp.float32, -k, k)
        b_ih = jax.random.uniform(k3, (4 * hidden_dim,), jnp.float32, -k, k)
        b_hh = jax.random.uniform(k4, (4 * hidden_dim,), jnp.float32, -k, k)
        params["rnn"].append((w_ih, w_hh, b_ih, b_hh))
    key, k5, k6 = jax.random.split(key, 3)
    ko = 1.0 / math.sqrt(hidden_dim)
    params["out_w"] = jax.random.uniform(k5, (output_dim, hidden_dim), jnp.float32, -ko, ko)
    params["out_b"] = jax.random.uniform(k6, (output_dim,), jnp.float32, -ko, ko)
    return params


# ------------------------------ pure-JAX reference ----------------------------
def lstm_ref(x, params):
    h_seq = x
    for (w_ih, w_hh, b_ih, b_hh) in params["rnn"]:
        B, T, _ = h_seq.shape
        H = w_hh.shape[1]
        h = jnp.zeros((B, H), jnp.float32)
        c = jnp.zeros((B, H), jnp.float32)
        outs = []
        for t in range(T):
            g = h_seq[:, t, :] @ w_ih.T + h @ w_hh.T + b_ih + b_hh
            i_g = jax.nn.sigmoid(g[:, 0 * H:1 * H])
            f_g = jax.nn.sigmoid(g[:, 1 * H:2 * H])
            g_g = jnp.tanh(g[:, 2 * H:3 * H])
            o_g = jax.nn.sigmoid(g[:, 3 * H:4 * H])
            c = f_g * c + i_g * g_g
            h = o_g * jnp.tanh(c)
            outs.append(h)
        h_seq = jnp.stack(outs, axis=1)
    return h_seq[:, -1, :] @ params["out_w"].T + params["out_b"]


if __name__ == "__main__":
    # batch=2, seq=8, input_dim=16, hidden_dim=32, num_layers=2, output_dim=8
    B, T, I, H, L, O = 2, 8, 16, 32, 2, 8

    key = jax.random.PRNGKey(0)
    key, kx, kx2 = jax.random.split(key, 3)
    x = jax.random.normal(kx, (B, T, I), jnp.float32)
    params = init_params(key, I, H, L, O)

    ref = lstm_ref(x, params)

    # f32 MXU-operand path (close match with reference).
    out = jax.block_until_ready(lstm_model_forward(x, params))
    assert out.shape == (B, O)
    assert jnp.allclose(out, ref, atol=1e-3, rtol=1e-3), float(jnp.max(jnp.abs(out - ref)))

    # Awkward sequence length -> exercises T padding + cross-block state carry.
    x2 = jax.random.normal(kx2, (B, 11, I), jnp.float32)
    ref2 = lstm_ref(x2, params)
    out2 = jax.block_until_ready(lstm_model_forward(x2, params))
    assert jnp.allclose(out2, ref2, atol=1e-3, rtol=1e-3), float(jnp.max(jnp.abs(out2 - ref2)))

    # bf16 MXU-operand path (recommended on v5e/v6e/v7x); state/gate math stays f32.
    out_bf16 = jax.block_until_ready(
        lstm_model_forward(x, params, mxu_dtype=jnp.bfloat16))
    assert jnp.allclose(out_bf16, ref, atol=1e-1, rtol=1e-1)

    print("KERNEL_OK")
</pallas_src>

<mosaic_0001>
module attributes {stable_mosaic.version = 11 : i64} {
  func.func @_lstm_fused_kernel(%arg0: i32, %arg1: i32, %arg2: memref<8x2x16xf32, #tpu.memory_space<vmem>>, %arg3: memref<16x128xf32, #tpu.memory_space<vmem>>, %arg4: memref<1x32x128xf32, #tpu.memory_space<vmem>>, %arg5: memref<2x32x128xf32, #tpu.memory_space<vmem>>, %arg6: memref<2x1x128xf32, #tpu.memory_space<vmem>>, %arg7: memref<32x8xf32, #tpu.memory_space<vmem>>, %arg8: memref<1x8xf32, #tpu.memory_space<vmem>>, %arg9: memref<2x8xf32, #tpu.memory_space<vmem>>, %arg10: memref<2x2x32xf32, #tpu.memory_space<vmem>>, %arg11: memref<2x2x32xf32, #tpu.memory_space<vmem>>, %arg12: memref<8x2x32xf32, #tpu.memory_space<vmem>>, %arg13: memref<8x2x128xf32, #tpu.memory_space<vmem>>) attributes {dimension_semantics = [#tpu.dimension_semantics<parallel>, #tpu.dimension_semantics<arbitrary>], iteration_bounds = array<i64: 1, 1>, scalar_prefetch = 0 : i64, scratch_operands = 4 : i64, tpu.core_type = #tpu.core_type<tc>, window_params = [{transform_indices = @transform_0, window_bounds = array<i64: 8, 2, 16>}, {pipeline_mode = #tpu.pipeline_mode<synchronous>, transform_indices = @transform_1, window_bounds = array<i64: 16, 128>}, {pipeline_mode = #tpu.pipeline_mode<synchronous>, transform_indices = @transform_2, window_bounds = array<i64: 1, 32, 128>}, {pipeline_mode = #tpu.pipeline_mode<synchronous>, transform_indices = @transform_3, window_bounds = array<i64: 2, 32, 128>}, {pipeline_mode = #tpu.pipeline_mode<synchronous>, transform_indices = @transform_4, window_bounds = array<i64: 2, 1, 128>}, {pipeline_mode = #tpu.pipeline_mode<synchronous>, transform_indices = @transform_5, window_bounds = array<i64: 32, 8>}, {pipeline_mode = #tpu.pipeline_mode<synchronous>, transform_indices = @transform_6, window_bounds = array<i64: 1, 8>}, {transform_indices = @transform_7, window_bounds = array<i64: 2, 8>}]} {
    %c0_i32 = arith.constant 0 : i32
    %0 = arith.cmpi eq, %arg1, %c0_i32 : i32
    %1 = arith.extui %0 : i1 to i32
    %c0_i32_0 = arith.constant 0 : i32
    %2 = arith.cmpi ne, %1, %c0_i32_0 : i32
    scf.if %2 {
      %cst_281 = arith.constant 0.000000e+00 : f32
      %635 = vector.broadcast %cst_281 : f32 to vector<2x2x32xf32>
      %c0_282 = arith.constant 0 : index
      %c0_283 = arith.constant 0 : index
      %c0_284 = arith.constant 0 : index
      %636 = vector.load %arg10[%c0_282, %c0_283, %c0_284] : memref<2x2x32xf32, #tpu.memory_space<vmem>>, vector<2x2x32xf32>
      tpu.vector_store %arg10[%c0_282, %c0_283, %c0_284], %635 {strides = array<i32>} : memref<2x2x32xf32, #tpu.memory_space<vmem>>, vector<2x2x32xf32>,
      %cst_285 = arith.constant 0.000000e+00 : f32
      %637 = vector.broadcast %cst_285 : f32 to vector<2x2x32xf32>
      %c0_286 = arith.constant 0 : index
      %c0_287 = arith.constant 0 : index
      %c0_288 = arith.constant 0 : index
      %638 = vector.load %arg11[%c0_286, %c0_287, %c0_288] : memref<2x2x32xf32, #tpu.memory_space<vmem>>, vector<2x2x32xf32>
      tpu.vector_store %arg11[%c0_286, %c0_287, %c0_288], %637 {strides = array<i32>} : memref<2x2x32xf32, #tpu.memory_space<vmem>>, vector<2x2x32xf32>,
    } else {
    }
    %c0 = arith.constant 0 : index
    %c0_1 = arith.constant 0 : index
    %c0_2 = arith.constant 0 : index
    %3 = vector.load %arg2[%c0, %c0_1, %c0_2] : memref<8x2x16xf32, #tpu.memory_space<vmem>>, vector<8x2x16xf32>
    %c0_3 = arith.constant 0 : index
    %c0_4 = arith.constant 0 : index
    %4 = vector.load %arg3[%c0_3, %c0_4] : memref<16x128xf32, #tpu.memory_space<vmem>>, vector<16x128xf32>
    %5 = vector.shape_cast %3 : vector<8x2x16xf32> to vector<16x16xf32>
    %cst = arith.constant dense<0.000000e+00> : vector<16x128xf32>
    %6 = tpu.matmul %5, %4, %cst {dimension_numbers = #tpu.dot_dimension_numbers<[1], [0], [0], [1], [0, 0, 1, 1], [], []>} : vector<16x16xf32>, vector<16x128xf32>, vector<16x128xf32> -> vector<16x128xf32>
    %c0_5 = arith.constant 0 : index
    %c0_6 = arith.constant 0 : index
    %c0_7 = arith.constant 0 : index
    %7 = vector.load %arg6[%c0_5, %c0_6, %c0_7] : memref<2x1x128xf32, #tpu.memory_space<vmem>>, vector<1x1x128xf32>
    %8 = vector.shape_cast %7 : vector<1x1x128xf32> to vector<1x128xf32>
    %9 = vector.broadcast %8 : vector<1x128xf32> to vector<16x128xf32>
    %10 = arith.addf %6, %9 : vector<16x128xf32>
    %11 = vector.shape_cast %10 : vector<16x128xf32> to vector<8x2x128xf32>
    %c0_8 = arith.constant 0 : index
    %c0_9 = arith.constant 0 : index
    %c0_10 = arith.constant 0 : index
    %12 = vector.load %arg13[%c0_8, %c0_9, %c0_10] : memref<8x2x128xf32, #tpu.memory_space<vmem>>, vector<8x2x128xf32>
    tpu.vector_store %arg13[%c0_8, %c0_9, %c0_10], %11 {strides = array<i32>} : memref<8x2x128xf32, #tpu.memory_space<vmem>>, vector<8x2x128xf32>,
    %c0_11 = arith.constant 0 : index
    %c0_12 = arith.constant 0 : index
    %c0_13 = arith.constant 0 : index
    %13 = vector.load %arg5[%c0_11, %c0_12, %c0_13] : memref<2x32x128xf32, #tpu.memory_space<vmem>>, vector<1x32x128xf32>
    %14 = vector.shape_cast %13 : vector<1x32x128xf32> to vector<32x128xf32>
    %c0_14 = arith.constant 0 : index
    %c0_15 = arith.constant 0 : index
    %c0_16 = arith.constant 0 : index
    %15 = vector.load %arg10[%c0_14, %c0_15, %c0_16] : memref<2x2x32xf32, #tpu.memory_space<vmem>>, vector<1x2x32xf32>
    %16 = vector.shape_cast %15 : vector<1x2x32xf32> to vector<2x32xf32>
    %c0_17 = arith.constant 0 : index
    %c0_18 = arith.constant 0 : index
    %c0_19 = arith.constant 0 : index
    %17 = vector.load %arg11[%c0_17, %c0_18, %c0_19] : memref<2x2x32xf32, #tpu.memory_space<vmem>>, vector<1x2x32xf32>
    %18 = vector.shape_cast %17 : vector<1x2x32xf32> to vector<2x32xf32>
    %c0_20 = arith.constant 0 : index
    %c0_21 = arith.constant 0 : index
    %c0_22 = arith.constant 0 : index
    %19 = vector.load %arg13[%c0_20, %c0_21, %c0_22] : memref<8x2x128xf32, #tpu.memory_space<vmem>>, vector<1x2x128xf32>
    %20 = vector.shape_cast %19 : vector<1x2x128xf32> to vector<2x128xf32>
    %cst_23 = arith.constant dense<0.000000e+00> : vector<2x128xf32>
    %21 = tpu.matmul %16, %14, %cst_23 {dimension_numbers = #tpu.dot_dimension_numbers<[1], [0], [0], [1], [0, 0, 1, 1], [], []>} : vector<2x32xf32>, vector<32x128xf32>, vector<2x128xf32> -> vector<2x128xf32>
    %22 = arith.addf %20, %21 : vector<2x128xf32>
    %23 = vector.extract_strided_slice %22 {offsets = [0, 0], sizes = [2, 32], strides = [1, 1]} : vector<2x128xf32> to vector<2x32xf32>
    %cst_24 = arith.constant 5.000000e-01 : f32
    %24 = vector.broadcast %cst_24 : f32 to vector<2x32xf32>
    %25 = arith.mulf %24, %23 : vector<2x32xf32>
    %26 = math.tanh %25 : vector<2x32xf32>
    %cst_25 = arith.constant 1.000000e+00 : f32
    %27 = vector.broadcast %cst_25 : f32 to vector<2x32xf32>
    %28 = arith.addf %26, %27 : vector<2x32xf32>
    %cst_26 = arith.constant 5.000000e-01 : f32
    %29 = vector.broadcast %cst_26 : f32 to vector<2x32xf32>
    %30 = arith.mulf %29, %28 : vector<2x32xf32>
    %31 = vector.extract_strided_slice %22 {offsets = [0, 32], sizes = [2, 32], strides = [1, 1]} : vector<2x128xf32> to vector<2x32xf32>
    %cst_27 = arith.constant 5.000000e-01 : f32
    %32 = vector.broadcast %cst_27 : f32 to vector<2x32xf32>
    %33 = arith.mulf %32, %31 : vector<2x32xf32>
    %34 = math.tanh %33 : vector<2x32xf32>
    %cst_28 = arith.constant 1.000000e+00 : f32
    %35 = vector.broadcast %cst_28 : f32 to vector<2x32xf32>
    %36 = arith.addf %34, %35 : vector<2x32xf32>
    %cst_29 = arith.constant 5.000000e-01 : f32
    %37 = vector.broadcast %cst_29 : f32 to vector<2x32xf32>
    %38 = arith.mulf %37, %36 : vector<2x32xf32>
    %39 = vector.extract_strided_slice %22 {offsets = [0, 64], sizes = [2, 32], strides = [1, 1]} : vector<2x128xf32> to vector<2x32xf32>
    %40 = math.tanh %39 : vector<2x32xf32>
    %41 = vector.extract_strided_slice %22 {offsets = [0, 96], sizes = [2, 32], strides = [1, 1]} : vector<2x128xf32> to vector<2x32xf32>
    %cst_30 = arith.constant 5.000000e-01 : f32
    %42 = vector.broadcast %cst_30 : f32 to vector<2x32xf32>
    %43 = arith.mulf %42, %41 : vector<2x32xf32>
    %44 = math.tanh %43 : vector<2x32xf32>
    %cst_31 = arith.constant 1.000000e+00 : f32
    %45 = vector.broadcast %cst_31 : f32 to vector<2x32xf32>
    %46 = arith.addf %44, %45 : vector<2x32xf32>
    %cst_32 = arith.constant 5.000000e-01 : f32
    %47 = vector.broadcast %cst_32 : f32 to vector<2x32xf32>
    %48 = arith.mulf %47, %46 : vector<2x32xf32>
    %49 = arith.mulf %38, %18 : vector<2x32xf32>
    %50 = arith.mulf %30, %40 : vector<2x32xf32>
    %51 = arith.addf %49, %50 : vector<2x32xf32>
    %52 = math.tanh %51 : vector<2x32xf32>
    %53 = arith.mulf %48, %52 : vector<2x32xf32>
    %c0_33 = arith.constant 0 : index
    %c0_34 = arith.constant 0 : index
    %c0_35 = arith.constant 0 : index
    %54 = vector.load %arg12[%c0_33, %c0_34, %c0_35] : memref<8x2x32xf32, #tpu.memory_space<vmem>>, vector<1x2x32xf32>
    %55 = vector.shape_cast %54 : vector<1x2x32xf32> to vector<2x32xf32>
    %56 = vector.shape_cast %53 : vector<2x32xf32> to vector<1x2x32xf32>
    tpu.vector_store %arg12[%c0_33, %c0_34, %c0_35], %56 {strides = array<i32>} : memref<8x2x32xf32, #tpu.memory_space<vmem>>, vector<1x2x32xf32>,
    %c1 = arith.constant 1 : index
    %c0_36 = arith.constant 0 : index
    %c0_37 = arith.constant 0 : index
    %57 = vector.load %arg13[%c1, %c0_36, %c0_37] : memref<8x2x128xf32, #tpu.memory_space<vmem>>, vector<1x2x128xf32>
    %58 = vector.shape_cast %57 : vector<1x2x128xf32> to vector<2x128xf32>
    %cst_38 = arith.constant dense<0.000000e+00> : vector<2x128xf32>
    %59 = tpu.matmul %53, %14, %cst_38 {dimension_numbers = #tpu.dot_dimension_numbers<[1], [0], [0], [1], [0, 0, 1, 1], [], []>} : vector<2x32xf32>, vector<32x128xf32>, vector<2x128xf32> -> vector<2x128xf32>
    %60 = arith.addf %58, %59 : vector<2x128xf32>
    %61 = vector.extract_strided_slice %60 {offsets = [0, 0], sizes = [2, 32], strides = [1, 1]} : vector<2x128xf32> to vector<2x32xf32>
    %cst_39 = arith.constant 5.000000e-01 : f32
    %62 = vector.broadcast %cst_39 : f32 to vector<2x32xf32>
    %63 = arith.mulf %62, %61 : vector<2x32xf32>
    %64 = math.tanh %63 : vector<2x32xf32>
    %cst_40 = arith.constant 1.000000e+00 : f32
    %65 = vector.broadcast %cst_40 : f32 to vector<2x32xf32>
    %66 = arith.addf %64, %65 : vector<2x32xf32>
    %cst_41 = arith.constant 5.000000e-01 : f32
    %67 = vector.broadcast %cst_41 : f32 to vector<2x32xf32>
    %68 = arith.mulf %67, %66 : vector<2x32xf32>
    %69 = vector.extract_strided_slice %60 {offsets = [0, 32], sizes = [2, 32], strides = [1, 1]} : vector<2x128xf32> to vector<2x32xf32>
    %cst_42 = arith.constant 5.000000e-01 : f32
    %70 = vector.broadcast %cst_42 : f32 to vector<2x32xf32>
    %71 = arith.mulf %70, %69 : vector<2x32xf32>
    %72 = math.tanh %71 : vector<2x32xf32>
    %cst_43 = arith.constant 1.000000e+00 : f32
    %73 = vector.broadcast %cst_43 : f32 to vector<2x32xf32>
    %74 = arith.addf %72, %73 : vector<2x32xf32>
    %cst_44 = arith.constant 5.000000e-01 : f32
    %75 = vector.broadcast %cst_44 : f32 to vector<2x32xf32>
    %76 = arith.mulf %75, %74 : vector<2x32xf32>
    %77 = vector.extract_strided_slice %60 {offsets = [0, 64], sizes = [2, 32], strides = [1, 1]} : vector<2x128xf32> to vector<2x32xf32>
    %78 = math.tanh %77 : vector<2x32xf32>
    %79 = vector.extract_strided_slice %60 {offsets = [0, 96], sizes = [2, 32], strides = [1, 1]} : vector<2x128xf32> to vector<2x32xf32>
    %cst_45 = arith.constant 5.000000e-01 : f32
    %80 = vector.broadcast %cst_45 : f32 to vector<2x32xf32>
    %81 = arith.mulf %80, %79 : vector<2x32xf32>
    %82 = math.tanh %81 : vector<2x32xf32>
    %cst_46 = arith.constant 1.000000e+00 : f32
    %83 = vector.broadcast %cst_46 : f32 to vector<2x32xf32>
    %84 = arith.addf %82, %83 : vector<2x32xf32>
    %cst_47 = arith.constant 5.000000e-01 : f32
    %85 = vector.broadcast %cst_47 : f32 to vector<2x32xf32>
    %86 = arith.mulf %85, %84 : vector<2x32xf32>
    %87 = arith.mulf %76, %51 : vector<2x32xf32>
    %88 = arith.mulf %68, %78 : vector<2x32xf32>
    %89 = arith.addf %87, %88 : vector<2x32xf32>
    %90 = math.tanh %89 : vector<2x32xf32>
    %91 = arith.mulf %86, %90 : vector<2x32xf32>
    %c1_48 = arith.constant 1 : index
    %c0_49 = arith.constant 0 : index
    %c0_50 = arith.constant 0 : index
    %92 = vector.load %arg12[%c1_48, %c0_49, %c0_50] : memref<8x2x32xf32, #tpu.memory_space<vmem>>, vector<1x2x32xf32>
    %93 = vector.shape_cast %92 : vector<1x2x32xf32> to vector<2x32xf32>
    %94 = vector.shape_cast %91 : vector<2x32xf32> to vector<1x2x32xf32>
    tpu.vector_store %arg12[%c1_48, %c0_49, %c0_50], %94 {strides = array<i32>} : memref<8x2x32xf32, #tpu.memory_space<vmem>>, vector<1x2x32xf32>,
    %c2 = arith.constant 2 : index
    %c0_51 = arith.constant 0 : index
    %c0_52 = arith.constant 0 : index
    %95 = vector.load %arg13[%c2, %c0_51, %c0_52] : memref<8x2x128xf32, #tpu.memory_space<vmem>>, vector<1x2x128xf32>
    %96 = vector.shape_cast %95 : vector<1x2x128xf32> to vector<2x128xf32>
    %cst_53 = arith.constant dense<0.000000e+00> : vector<2x128xf32>
    %97 = tpu.matmul %91, %14, %cst_53 {dimension_numbers = #tpu.dot_dimension_numbers<[1], [0], [0], [1], [0, 0, 1, 1], [], []>} : vector<2x32xf32>, vector<32x128xf32>, vector<2x128xf32> -> vector<2x128xf32>
    %98 = arith.addf %96, %97 : vector<2x128xf32>
    %99 = vector.extract_strided_slice %98 {offsets = [0, 0], sizes = [2, 32], strides = [1, 1]} : vector<2x128xf32> to vector<2x32xf32>
    %cst_54 = arith.constant 5.000000e-01 : f32
    %100 = vector.broadcast %cst_54 : f32 to vector<2x32xf32>
    %101 = arith.mulf %100, %99 : vector<2x32xf32>
    %102 = math.tanh %101 : vector<2x32xf32>
    %cst_55 = arith.constant 1.000000e+00 : f32
    %103 = vector.broadcast %cst_55 : f32 to vector<2x32xf32>
    %104 = arith.addf %102, %103 : vector<2x32xf32>
    %cst_56 = arith.constant 5.000000e-01 : f32
    %105 = vector.broadcast %cst_56 : f32 to vector<2x32xf32>
    %106 = arith.mulf %105, %104 : vector<2x32xf32>
    %107 = vector.extract_strided_slice %98 {offsets = [0, 32], sizes = [2, 32], strides = [1, 1]} : vector<2x128xf32> to vector<2x32xf32>
    %cst_57 = arith.constant 5.000000e-01 : f32
    %108 = vector.broadcast %cst_57 : f32 to vector<2x32xf32>
    %109 = arith.mulf %108, %107 : vector<2x32xf32>
    %110 = math.tanh %109 : vector<2x32xf32>
    %cst_58 = arith.constant 1.000000e+00 : f32
    %111 = vector.broadcast %cst_58 : f32 to vector<2x32xf32>
    %112 = arith.addf %110, %111 : vector<2x32xf32>
    %cst_59 = arith.constant 5.000000e-01 : f32
    %113 = vector.broadcast %cst_59 : f32 to vector<2x32xf32>
    %114 = arith.mulf %113, %112 : vector<2x32xf32>
    %115 = vector.extract_strided_slice %98 {offsets = [0, 64], sizes = [2, 32], strides = [1, 1]} : vector<2x128xf32> to vector<2x32xf32>
    %116 = math.tanh %115 : vector<2x32xf32>
    %117 = vector.extract_strided_slice %98 {offsets = [0, 96], sizes = [2, 32], strides = [1, 1]} : vector<2x128xf32> to vector<2x32xf32>
    %cst_60 = arith.constant 5.000000e-01 : f32
    %118 = vector.broadcast %cst_60 : f32 to vector<2x32xf32>
    %119 = arith.mulf %118, %117 : vector<2x32xf32>
    %120 = math.tanh %119 : vector<2x32xf32>
    %cst_61 = arith.constant 1.000000e+00 : f32
    %121 = vector.broadcast %cst_61 : f32 to vector<2x32xf32>
    %122 = arith.addf %120, %121 : vector<2x32xf32>
    %cst_62 = arith.constant 5.000000e-01 : f32
    %123 = vector.broadcast %cst_62 : f32 to vector<2x32xf32>
    %124 = arith.mulf %123, %122 : vector<2x32xf32>
    %125 = arith.mulf %114, %89 : vector<2x32xf32>
    %126 = arith.mulf %106, %116 : vector<2x32xf32>
    %127 = arith.addf %125, %126 : vector<2x32xf32>
    %128 = math.tanh %127 : vector<2x32xf32>
    %129 = arith.mulf %124, %128 : vector<2x32xf32>
    %c2_63 = arith.constant 2 : index
    %c0_64 = arith.constant 0 : index
    %c0_65 = arith.constant 0 : index
    %130 = vector.load %arg12[%c2_63, %c0_64, %c0_65] : memref<8x2x32xf32, #tpu.memory_space<vmem>>, vector<1x2x32xf32>
    %131 = vector.shape_cast %130 : vector<1x2x32xf32> to vector<2x32xf32>
    %132 = vector.shape_cast %129 : vector<2x32xf32> to vector<1x2x32xf32>
    tpu.vector_store %arg12[%c2_63, %c0_64, %c0_65], %132 {strides = array<i32>} : memref<8x2x32xf32, #tpu.memory_space<vmem>>, vector<1x2x32xf32>,
    %c3 = arith.constant 3 : index
    %c0_66 = arith.constant 0 : index
    %c0_67 = arith.constant 0 : index
    %133 = vector.load %arg13[%c3, %c0_66, %c0_67] : memref<8x2x128xf32, #tpu.memory_space<vmem>>, vector<1x2x128xf32>
    %134 = vector.shape_cast %133 : vector<1x2x128xf32> to vector<2x128xf32>
    %cst_68 = arith.constant dense<0.000000e+00> : vector<2x128xf32>
    %135 = tpu.matmul %129, %14, %cst_68 {dimension_numbers = #tpu.dot_dimension_numbers<[1], [0], [0], [1], [0, 0, 1, 1], [], []>} : vector<2x32xf32>, vector<32x128xf32>, vector<2x128xf32> -> vector<2x128xf32>
    %136 = arith.addf %134, %135 : vector<2x128xf32>
    %137 = vector.extract_strided_slice %136 {offsets = [0, 0], sizes = [2, 32], strides = [1, 1]} : vector<2x128xf32> to vector<2x32xf32>
    %cst_69 = arith.constant 5.000000e-01 : f32
    %138 = vector.broadcast %cst_69 : f32 to vector<2x32xf32>
    %139 = arith.mulf %138, %137 : vector<2x32xf32>
    %140 = math.tanh %139 : vector<2x32xf32>
    %cst_70 = arith.constant 1.000000e+00 : f32
    %141 = vector.broadcast %cst_70 : f32 to vector<2x32xf32>
    %142 = arith.addf %140, %141 : vector<2x32xf32>
    %cst_71 = arith.constant 5.000000e-01 : f32
    %143 = vector.broadcast %cst_71 : f32 to vector<2x32xf32>
    %144 = arith.mulf %143, %142 : vector<2x32xf32>
    %145 = vector.extract_strided_slice %136 {offsets = [0, 32], sizes = [2, 32], strides = [1, 1]} : vector<2x128xf32> to vector<2x32xf32>
    %cst_72 = arith.constant 5.000000e-01 : f32
    %146 = vector.broadcast %cst_72 : f32 to vector<2x32xf32>
    %147 = arith.mulf %146, %145 : vector<2x32xf32>
    %148 = math.tanh %147 : vector<2x32xf32>
    %cst_73 = arith.constant 1.000000e+00 : f32
    %149 = vector.broadcast %cst_73 : f32 to vector<2x32xf32>
    %150 = arith.addf %148, %149 : vector<2x32xf32>
    %cst_74 = arith.constant 5.000000e-01 : f32
    %151 = vector.broadcast %cst_74 : f32 to vector<2x32xf32>
    %152 = arith.mulf %151, %150 : vector<2x32xf32>
    %153 = vector.extract_strided_slice %136 {offsets = [0, 64], sizes = [2, 32], strides = [1, 1]} : vector<2x128xf32> to vector<2x32xf32>
    %154 = math.tanh %153 : vector<2x32xf32>
    %155 = vector.extract_strided_slice %136 {offsets = [0, 96], sizes = [2, 32], strides = [1, 1]} : vector<2x128xf32> to vector<2x32xf32>
    %cst_75 = arith.constant 5.000000e-01 : f32
    %156 = vector.broadcast %cst_75 : f32 to vector<2x32xf32>
    %157 = arith.mulf %156, %155 : vector<2x32xf32>
    %158 = math.tanh %157 : vector<2x32xf32>
    %cst_76 = arith.constant 1.000000e+00 : f32
    %159 = vector.broadcast %cst_76 : f32 to vector<2x32xf32>
    %160 = arith.addf %158, %159 : vector<2x32xf32>
    %cst_77 = arith.constant 5.000000e-01 : f32
    %161 = vector.broadcast %cst_77 : f32 to vector<2x32xf32>
    %162 = arith.mulf %161, %160 : vector<2x32xf32>
    %163 = arith.mulf %152, %127 : vector<2x32xf32>
    %164 = arith.mulf %144, %154 : vector<2x32xf32>
    %165 = arith.addf %163, %164 : vector<2x32xf32>
    %166 = math.tanh %165 : vector<2x32xf32>
    %167 = arith.mulf %162, %166 : vector<2x32xf32>
    %c3_78 = arith.constant 3 : index
    %c0_79 = arith.constant 0 : index
    %c0_80 = arith.constant 0 : index
    %168 = vector.load %arg12[%c3_78, %c0_79, %c0_80] : memref<8x2x32xf32, #tpu.memory_space<vmem>>, vector<1x2x32xf32>
    %169 = vector.shape_cast %168 : vector<1x2x32xf32> to vector<2x32xf32>
    %170 = vector.shape_cast %167 : vector<2x32xf32> to vector<1x2x32xf32>
    tpu.vector_store %arg12[%c3_78, %c0_79, %c0_80], %170 {strides = array<i32>} : memref<8x2x32xf32, #tpu.memory_space<vmem>>, vector<1x2x32xf32>,
    %c4 = arith.constant 4 : index
    %c0_81 = arith.constant 0 : index
    %c0_82 = arith.constant 0 : index
    %171 = vector.load %arg13[%c4, %c0_81, %c0_82] : memref<8x2x128xf32, #tpu.memory_space<vmem>>, vector<1x2x128xf32>
    %172 = vector.shape_cast %171 : vector<1x2x128xf32> to vector<2x128xf32>
    %cst_83 = arith.constant dense<0.000000e+00> : vector<2x128xf32>
    %173 = tpu.matmul %167, %14, %cst_83 {dimension_numbers = #tpu.dot_dimension_numbers<[1], [0], [0], [1], [0, 0, 1, 1], [], []>} : vector<2x32xf32>, vector<32x128xf32>, vector<2x128xf32> -> vector<2x128xf32>
    %174 = arith.addf %172, %173 : vector<2x128xf32>
    %175 = vector.extract_strided_slice %174 {offsets = [0, 0], sizes = [2, 32], strides = [1, 1]} : vector<2x128xf32> to vector<2x32xf32>
    %cst_84 = arith.constant 5.000000e-01 : f32
    %176 = vector.broadcast %cst_84 : f32 to vector<2x32xf32>
    %177 = arith.mulf %176, %175 : vector<2x32xf32>
    %178 = math.tanh %177 : vector<2x32xf32>
    %cst_85 = arith.constant 1.000000e+00 : f32
    %179 = vector.broadcast %cst_85 : f32 to vector<2x32xf32>
    %180 = arith.addf %178, %179 : vector<2x32xf32>
    %cst_86 = arith.constant 5.000000e-01 : f32
    %181 = vector.broadcast %cst_86 : f32 to vector<2x32xf32>
    %182 = arith.mulf %181, %180 : vector<2x32xf32>
    %183 = vector.extract_strided_slice %174 {offsets = [0, 32], sizes = [2, 32], strides = [1, 1]} : vector<2x128xf32> to vector<2x32xf32>
    %cst_87 = arith.constant 5.000000e-01 : f32
    %184 = vector.broadcast %cst_87 : f32 to vector<2x32xf32>
    %185 = arith.mulf %184, %183 : vector<2x32xf32>
    %186 = math.tanh %185 : vector<2x32xf32>
    %cst_88 = arith.constant 1.000000e+00 : f32
    %187 = vector.broadcast %cst_88 : f32 to vector<2x32xf32>
    %188 = arith.addf %186, %187 : vector<2x32xf32>
    %cst_89 = arith.constant 5.000000e-01 : f32
    %189 = vector.broadcast %cst_89 : f32 to vector<2x32xf32>
    %190 = arith.mulf %189, %188 : vector<2x32xf32>
    %191 = vector.extract_strided_slice %174 {offsets = [0, 64], sizes = [2, 32], strides = [1, 1]} : vector<2x128xf32> to vector<2x32xf32>
    %192 = math.tanh %191 : vector<2x32xf32>
    %193 = vector.extract_strided_slice %174 {offsets = [0, 96], sizes = [2, 32], strides = [1, 1]} : vector<2x128xf32> to vector<2x32xf32>
    %cst_90 = arith.constant 5.000000e-01 : f32
    %194 = vector.broadcast %cst_90 : f32 to vector<2x32xf32>
    %195 = arith.mulf %194, %193 : vector<2x32xf32>
    %196 = math.tanh %195 : vector<2x32xf32>
    %cst_91 = arith.constant 1.000000e+00 : f32
    %197 = vector.broadcast %cst_91 : f32 to vector<2x32xf32>
    %198 = arith.addf %196, %197 : vector<2x32xf32>
    %cst_92 = arith.constant 5.000000e-01 : f32
    %199 = vector.broadcast %cst_92 : f32 to vector<2x32xf32>
    %200 = arith.mulf %199, %198 : vector<2x32xf32>
    %201 = arith.mulf %190, %165 : vector<2x32xf32>
    %202 = arith.mulf %182, %192 : vector<2x32xf32>
    %203 = arith.addf %201, %202 : vector<2x32xf32>
    %204 = math.tanh %203 : vector<2x32xf32>
    %205 = arith.mulf %200, %204 : vector<2x32xf32>
    %c4_93 = arith.constant 4 : index
    %c0_94 = arith.constant 0 : index
    %c0_95 = arith.constant 0 : index
    %206 = vector.load %arg12[%c4_93, %c0_94, %c0_95] : memref<8x2x32xf32, #tpu.memory_space<vmem>>, vector<1x2x32xf32>
    %207 = vector.shape_cast %206 : vector<1x2x32xf32> to vector<2x32xf32>
    %208 = vector.shape_cast %205 : vector<2x32xf32> to vector<1x2x32xf32>
    tpu.vector_store %arg12[%c4_93, %c0_94, %c0_95], %208 {strides = array<i32>} : memref<8x2x32xf32, #tpu.memory_space<vmem>>, vector<1x2x32xf32>,
    %c5 = arith.constant 5 : index
    %c0_96 = arith.constant 0 : index
    %c0_97 = arith.constant 0 : index
    %209 = vector.load %arg13[%c5, %c0_96, %c0_97] : memref<8x2x128xf32, #tpu.memory_space<vmem>>, vector<1x2x128xf32>
    %210 = vector.shape_cast %209 : vector<1x2x128xf32> to vector<2x128xf32>
    %cst_98 = arith.constant dense<0.000000e+00> : vector<2x128xf32>
    %211 = tpu.matmul %205, %14, %cst_98 {dimension_numbers = #tpu.dot_dimension_numbers<[1], [0], [0], [1], [0, 0, 1, 1], [], []>} : vector<2x32xf32>, vector<32x128xf32>, vector<2x128xf32> -> vector<2x128xf32>
    %212 = arith.addf %210, %211 : vector<2x128xf32>
    %213 = vector.extract_strided_slice %212 {offsets = [0, 0], sizes = [2, 32], strides = [1, 1]} : vector<2x128xf32> to vector<2x32xf32>
    %cst_99 = arith.constant 5.000000e-01 : f32
    %214 = vector.broadcast %cst_99 : f32 to vector<2x32xf32>
    %215 = arith.mulf %214, %213 : vector<2x32xf32>
    %216 = math.tanh %215 : vector<2x32xf32>
    %cst_100 = arith.constant 1.000000e+00 : f32
    %217 = vector.broadcast %cst_100 : f32 to vector<2x32xf32>
    %218 = arith.addf %216, %217 : vector<2x32xf32>
    %cst_101 = arith.constant 5.000000e-01 : f32
    %219 = vector.broadcast %cst_101 : f32 to vector<2x32xf32>
    %220 = arith.mulf %219, %218 : vector<2x32xf32>
    %221 = vector.extract_strided_slice %212 {offsets = [0, 32], sizes = [2, 32], strides = [1, 1]} : vector<2x128xf32> to vector<2x32xf32>
    %cst_102 = arith.constant 5.000000e-01 : f32
    %222 = vector.broadcast %cst_102 : f32 to vector<2x32xf32>
    %223 = arith.mulf %222, %221 : vector<2x32xf32>
    %224 = math.tanh %223 : vector<2x32xf32>
    %cst_103 = arith.constant 1.000000e+00 : f32
    %225 = vector.broadcast %cst_103 : f32 to vector<2x32xf32>
    %226 = arith.addf %224, %225 : vector<2x32xf32>
    %cst_104 = arith.constant 5.000000e-01 : f32
    %227 = vector.broadcast %cst_104 : f32 to vector<2x32xf32>
    %228 = arith.mulf %227, %226 : vector<2x32xf32>
    %229 = vector.extract_strided_slice %212 {offsets = [0, 64], sizes = [2, 32], strides = [1, 1]} : vector<2x128xf32> to vector<2x32xf32>
    %230 = math.tanh %229 : vector<2x32xf32>
    %231 = vector.extract_strided_slice %212 {offsets = [0, 96], sizes = [2, 32], strides = [1, 1]} : vector<2x128xf32> to vector<2x32xf32>
    %cst_105 = arith.constant 5.000000e-01 : f32
    %232 = vector.broadcast %cst_105 : f32 to vector<2x32xf32>
    %233 = arith.mulf %232, %231 : vector<2x32xf32>
    %234 = math.tanh %233 : vector<2x32xf32>
    %cst_106 = arith.constant 1.000000e+00 : f32
    %235 = vector.broadcast %cst_106 : f32 to vector<2x32xf32>
    %236 = arith.addf %234, %235 : vector<2x32xf32>
    %cst_107 = arith.constant 5.000000e-01 : f32
    %237 = vector.broadcast %cst_107 : f32 to vector<2x32xf32>
    %238 = arith.mulf %237, %236 : vector<2x32xf32>
    %239 = arith.mulf %228, %203 : vector<2x32xf32>
    %240 = arith.mulf %220, %230 : vector<2x32xf32>
    %241 = arith.addf %239, %240 : vector<2x32xf32>
    %242 = math.tanh %241 : vector<2x32xf32>
    %243 = arith.mulf %238, %242 : vector<2x32xf32>
    %c5_108 = arith.constant 5 : index
    %c0_109 = arith.constant 0 : index
    %c0_110 = arith.constant 0 : index
    %244 = vector.load %arg12[%c5_108, %c0_109, %c0_110] : memref<8x2x32xf32, #tpu.memory_space<vmem>>, vector<1x2x32xf32>
    %245 = vector.shape_cast %244 : vector<1x2x32xf32> to vector<2x32xf32>
    %246 = vector.shape_cast %243 : vector<2x32xf32> to vector<1x2x32xf32>
    tpu.vector_store %arg12[%c5_108, %c0_109, %c0_110], %246 {strides = array<i32>} : memref<8x2x32xf32, #tpu.memory_space<vmem>>, vector<1x2x32xf32>,
    %c6 = arith.constant 6 : index
    %c0_111 = arith.constant 0 : index
    %c0_112 = arith.constant 0 : index
    %247 = vector.load %arg13[%c6, %c0_111, %c0_112] : memref<8x2x128xf32, #tpu.memory_space<vmem>>, vector<1x2x128xf32>
    %248 = vector.shape_cast %247 : vector<1x2x128xf32> to vector<2x128xf32>
    %cst_113 = arith.constant dense<0.000000e+00> : vector<2x128xf32>
    %249 = tpu.matmul %243, %14, %cst_113 {dimension_numbers = #tpu.dot_dimension_numbers<[1], [0], [0], [1], [0, 0, 1, 1], [], []>} : vector<2x32xf32>, vector<32x128xf32>, vector<2x128xf32> -> vector<2x128xf32>
    %250 = arith.addf %248, %249 : vector<2x128xf32>
    %251 = vector.extract_strided_slice %250 {offsets = [0, 0], sizes = [2, 32], strides = [1, 1]} : vector<2x128xf32> to vector<2x32xf32>
    %cst_114 = arith.constant 5.000000e-01 : f32
    %252 = vector.broadcast %cst_114 : f32 to vector<2x32xf32>
    %253 = arith.mulf %252, %251 : vector<2x32xf32>
    %254 = math.tanh %253 : vector<2x32xf32>
    %cst_115 = arith.constant 1.000000e+00 : f32
    %255 = vector.broadcast %cst_115 : f32 to vector<2x32xf32>
    %256 = arith.addf %254, %255 : vector<2x32xf32>
    %cst_116 = arith.constant 5.000000e-01 : f32
    %257 = vector.broadcast %cst_116 : f32 to vector<2x32xf32>
    %258 = arith.mulf %257, %256 : vector<2x32xf32>
    %259 = vector.extract_strided_slice %250 {offsets = [0, 32], sizes = [2, 32], strides = [1, 1]} : vector<2x128xf32> to vector<2x32xf32>
    %cst_117 = arith.constant 5.000000e-01 : f32
    %260 = vector.broadcast %cst_117 : f32 to vector<2x32xf32>
    %261 = arith.mulf %260, %259 : vector<2x32xf32>
    %262 = math.tanh %261 : vector<2x32xf32>
    %cst_118 = arith.constant 1.000000e+00 : f32
    %263 = vector.broadcast %cst_118 : f32 to vector<2x32xf32>
    %264 = arith.addf %262, %263 : vector<2x32xf32>
    %cst_119 = arith.constant 5.000000e-01 : f32
    %265 = vector.broadcast %cst_119 : f32 to vector<2x32xf32>
    %266 = arith.mulf %265, %264 : vector<2x32xf32>
    %267 = vector.extract_strided_slice %250 {offsets = [0, 64], sizes = [2, 32], strides = [1, 1]} : vector<2x128xf32> to vector<2x32xf32>
    %268 = math.tanh %267 : vector<2x32xf32>
    %269 = vector.extract_strided_slice %250 {offsets = [0, 96], sizes = [2, 32], strides = [1, 1]} : vector<2x128xf32> to vector<2x32xf32>
    %cst_120 = arith.constant 5.000000e-01 : f32
    %270 = vector.broadcast %cst_120 : f32 to vector<2x32xf32>
    %271 = arith.mulf %270, %269 : vector<2x32xf32>
    %272 = math.tanh %271 : vector<2x32xf32>
    %cst_121 = arith.constant 1.000000e+00 : f32
    %273 = vector.broadcast %cst_121 : f32 to vector<2x32xf32>
    %274 = arith.addf %272, %273 : vector<2x32xf32>
    %cst_122 = arith.constant 5.000000e-01 : f32
    %275 = vector.broadcast %cst_122 : f32 to vector<2x32xf32>
    %276 = arith.mulf %275, %274 : vector<2x32xf32>
    %277 = arith.mulf %266, %241 : vector<2x32xf32>
    %278 = arith.mulf %258, %268 : vector<2x32xf32>
    %279 = arith.addf %277, %278 : vector<2x32xf32>
    %280 = math.tanh %279 : vector<2x32xf32>
    %281 = arith.mulf %276, %280 : vector<2x32xf32>
    %c6_123 = arith.constant 6 : index
    %c0_124 = arith.constant 0 : index
    %c0_125 = arith.constant 0 : index
    %282 = vector.load %arg12[%c6_123, %c0_124, %c0_125] : memref<8x2x32xf32, #tpu.memory_space<vmem>>, vector<1x2x32xf32>
    %283 = vector.shape_cast %282 : vector<1x2x32xf32> to vector<2x32xf32>
    %284 = vector.shape_cast %281 : vector<2x32xf32> to vector<1x2x32xf32>
    tpu.vector_store %arg12[%c6_123, %c0_124, %c0_125], %284 {strides = array<i32>} : memref<8x2x32xf32, #tpu.memory_space<vmem>>, vector<1x2x32xf32>,
    %c7 = arith.constant 7 : index
    %c0_126 = arith.constant 0 : index
    %c0_127 = arith.constant 0 : index
    %285 = vector.load %arg13[%c7, %c0_126, %c0_127] : memref<8x2x128xf32, #tpu.memory_space<vmem>>, vector<1x2x128xf32>
    %286 = vector.shape_cast %285 : vector<1x2x128xf32> to vector<2x128xf32>
    %cst_128 = arith.constant dense<0.000000e+00> : vector<2x128xf32>
    %287 = tpu.matmul %281, %14, %cst_128 {dimension_numbers = #tpu.dot_dimension_numbers<[1], [0], [0], [1], [0, 0, 1, 1], [], []>} : vector<2x32xf32>, vector<32x128xf32>, vector<2x128xf32> -> vector<2x128xf32>
    %288 = arith.addf %286, %287 : vector<2x128xf32>
    %289 = vector.extract_strided_slice %288 {offsets = [0, 0], sizes = [2, 32], strides = [1, 1]} : vector<2x128xf32> to vector<2x32xf32>
    %cst_129 = arith.constant 5.000000e-01 : f32
    %290 = vector.broadcast %cst_129 : f32 to vector<2x32xf32>
    %291 = arith.mulf %290, %289 : vector<2x32xf32>
    %292 = math.tanh %291 : vector<2x32xf32>
    %cst_130 = arith.constant 1.000000e+00 : f32
    %293 = vector.broadcast %cst_130 : f32 to vector<2x32xf32>
    %294 = arith.addf %292, %293 : vector<2x32xf32>
    %cst_131 = arith.constant 5.000000e-01 : f32
    %295 = vector.broadcast %cst_131 : f32 to vector<2x32xf32>
    %296 = arith.mulf %295, %294 : vector<2x32xf32>
    %297 = vector.extract_strided_slice %288 {offsets = [0, 32], sizes = [2, 32], strides = [1, 1]} : vector<2x128xf32> to vector<2x32xf32>
    %cst_132 = arith.constant 5.000000e-01 : f32
    %298 = vector.broadcast %cst_132 : f32 to vector<2x32xf32>
    %299 = arith.mulf %298, %297 : vector<2x32xf32>
    %300 = math.tanh %299 : vector<2x32xf32>
    %cst_133 = arith.constant 1.000000e+00 : f32
    %301 = vector.broadcast %cst_133 : f32 to vector<2x32xf32>
    %302 = arith.addf %300, %301 : vector<2x32xf32>
    %cst_134 = arith.constant 5.000000e-01 : f32
    %303 = vector.broadcast %cst_134 : f32 to vector<2x32xf32>
    %304 = arith.mulf %303, %302 : vector<2x32xf32>
    %305 = vector.extract_strided_slice %288 {offsets = [0, 64], sizes = [2, 32], strides = [1, 1]} : vector<2x128xf32> to vector<2x32xf32>
    %306 = math.tanh %305 : vector<2x32xf32>
    %307 = vector.extract_strided_slice %288 {offsets = [0, 96], sizes = [2, 32], strides = [1, 1]} : vector<2x128xf32> to vector<2x32xf32>
    %cst_135 = arith.constant 5.000000e-01 : f32
    %308 = vector.broadcast %cst_135 : f32 to vector<2x32xf32>
    %309 = arith.mulf %308, %307 : vector<2x32xf32>
    %310 = math.tanh %309 : vector<2x32xf32>
    %cst_136 = arith.constant 1.000000e+00 : f32
    %311 = vector.broadcast %cst_136 : f32 to vector<2x32xf32>
    %312 = arith.addf %310, %311 : vector<2x32xf32>
    %cst_137 = arith.constant 5.000000e-01 : f32
    %313 = vector.broadcast %cst_137 : f32 to vector<2x32xf32>
    %314 = arith.mulf %313, %312 : vector<2x32xf32>
    %315 = arith.mulf %304, %279 : vector<2x32xf32>
    %316 = arith.mulf %296, %306 : vector<2x32xf32>
    %317 = arith.addf %315, %316 : vector<2x32xf32>
    %318 = math.tanh %317 : vector<2x32xf32>
    %319 = arith.mulf %314, %318 : vector<2x32xf32>
    %c7_138 = arith.constant 7 : index
    %c0_139 = arith.constant 0 : index
    %c0_140 = arith.constant 0 : index
    %320 = vector.load %arg12[%c7_138, %c0_139, %c0_140] : memref<8x2x32xf32, #tpu.memory_space<vmem>>, vector<1x2x32xf32>
    %321 = vector.shape_cast %320 : vector<1x2x32xf32> to vector<2x32xf32>
    %322 = vector.shape_cast %319 : vector<2x32xf32> to vector<1x2x32xf32>
    tpu.vector_store %arg12[%c7_138, %c0_139, %c0_140], %322 {strides = array<i32>} : memref<8x2x32xf32, #tpu.memory_space<vmem>>, vector<1x2x32xf32>,
    %c0_141 = arith.constant 0 : index
    %c0_142 = arith.constant 0 : index
    %c0_143 = arith.constant 0 : index
    %323 = vector.load %arg10[%c0_141, %c0_142, %c0_143] : memref<2x2x32xf32, #tpu.memory_space<vmem>>, vector<1x2x32xf32>
    %324 = vector.shape_cast %323 : vector<1x2x32xf32> to vector<2x32xf32>
    %325 = vector.shape_cast %319 : vector<2x32xf32> to vector<1x2x32xf32>
    tpu.vector_store %arg10[%c0_141, %c0_142, %c0_143], %325 {strides = array<i32>} : memref<2x2x32xf32, #tpu.memory_space<vmem>>, vector<1x2x32xf32>,
    %c0_144 = arith.constant 0 : index
    %c0_145 = arith.constant 0 : index
    %c0_146 = arith.constant 0 : index
    %326 = vector.load %arg11[%c0_144, %c0_145, %c0_146] : memref<2x2x32xf32, #tpu.memory_space<vmem>>, vector<1x2x32xf32>
    %327 = vector.shape_cast %326 : vector<1x2x32xf32> to vector<2x32xf32>
    %328 = vector.shape_cast %317 : vector<2x32xf32> to vector<1x2x32xf32>
    tpu.vector_store %arg11[%c0_144, %c0_145, %c0_146], %328 {strides = array<i32>} : memref<2x2x32xf32, #tpu.memory_space<vmem>>, vector<1x2x32xf32>,
    %c0_147 = arith.constant 0 : index
    %c0_148 = arith.constant 0 : index
    %c0_149 = arith.constant 0 : index
    %329 = vector.load %arg12[%c0_147, %c0_148, %c0_149] : memref<8x2x32xf32, #tpu.memory_space<vmem>>, vector<8x2x32xf32>
    %c0_150 = arith.constant 0 : index
    %c0_151 = arith.constant 0 : index
    %c0_152 = arith.constant 0 : index
    %330 = vector.load %arg4[%c0_150, %c0_151, %c0_152] : memref<1x32x128xf32, #tpu.memory_space<vmem>>, vector<1x32x128xf32>
    %331 = vector.shape_cast %330 : vector<1x32x128xf32> to vector<32x128xf32>
    %332 = vector.shape_cast %329 : vector<8x2x32xf32> to vector<16x32xf32>
    %cst_153 = arith.constant dense<0.000000e+00> : vector<16x128xf32>
    %333 = tpu.matmul %332, %331, %cst_153 {dimension_numbers = #tpu.dot_dimension_numbers<[1], [0], [0], [1], [0, 0, 1, 1], [], []>} : vector<16x32xf32>, vector<32x128xf32>, vector<16x128xf32> -> vector<16x128xf32>
    %c1_154 = arith.constant 1 : index
    %c0_155 = arith.constant 0 : index
    %c0_156 = arith.constant 0 : index
    %334 = vector.load %arg6[%c1_154, %c0_155, %c0_156] : memref<2x1x128xf32, #tpu.memory_space<vmem>>, vector<1x1x128xf32>
    %335 = vector.shape_cast %334 : vector<1x1x128xf32> to vector<1x128xf32>
    %336 = vector.broadcast %335 : vector<1x128xf32> to vector<16x128xf32>
    %337 = arith.addf %333, %336 : vector<16x128xf32>
    %338 = vector.shape_cast %337 : vector<16x128xf32> to vector<8x2x128xf32>
    %c0_157 = arith.constant 0 : index
    %c0_158 = arith.constant 0 : index
    %c0_159 = arith.constant 0 : index
    %339 = vector.load %arg13[%c0_157, %c0_158, %c0_159] : memref<8x2x128xf32, #tpu.memory_space<vmem>>, vector<8x2x128xf32>
    tpu.vector_store %arg13[%c0_157, %c0_158, %c0_159], %338 {strides = array<i32>} : memref<8x2x128xf32, #tpu.memory_space<vmem>>, vector<8x2x128xf32>,
    %c1_160 = arith.constant 1 : index
    %c0_161 = arith.constant 0 : index
    %c0_162 = arith.constant 0 : index
    %340 = vector.load %arg5[%c1_160, %c0_161, %c0_162] : memref<2x32x128xf32, #tpu.memory_space<vmem>>, vector<1x32x128xf32>
    %341 = vector.shape_cast %340 : vector<1x32x128xf32> to vector<32x128xf32>
    %c1_163 = arith.constant 1 : index
    %c0_164 = arith.constant 0 : index
    %c0_165 = arith.constant 0 : index
    %342 = vector.load %arg10[%c1_163, %c0_164, %c0_165] : memref<2x2x32xf32, #tpu.memory_space<vmem>>, vector<1x2x32xf32>
    %343 = vector.shape_cast %342 : vector<1x2x32xf32> to vector<2x32xf32>
    %c1_166 = arith.constant 1 : index
    %c0_167 = arith.constant 0 : index
    %c0_168 = arith.constant 0 : index
    %344 = vector.load %arg11[%c1_166, %c0_167, %c0_168] : memref<2x2x32xf32, #tpu.memory_space<vmem>>, vector<1x2x32xf32>
    %345 = vector.shape_cast %344 : vector<1x2x32xf32> to vector<2x32xf32>
    %c0_169 = arith.constant 0 : index
    %c0_170 = arith.constant 0 : index
    %c0_171 = arith.constant 0 : index
    %346 = vector.load %arg13[%c0_169, %c0_170, %c0_171] : memref<8x2x128xf32, #tpu.memory_space<vmem>>, vector<1x2x128xf32>
    %347 = vector.shape_cast %346 : vector<1x2x128xf32> to vector<2x128xf32>
    %cst_172 = arith.constant dense<0.000000e+00> : vector<2x128xf32>
    %348 = tpu.matmul %343, %341, %cst_172 {dimension_numbers = #tpu.dot_dimension_numbers<[1], [0], [0], [1], [0, 0, 1, 1], [], []>} : vector<2x32xf32>, vector<32x128xf32>, vector<2x128xf32> -> vector<2x128xf32>
    %349 = arith.addf %347, %348 : vector<2x128xf32>
    %350 = vector.extract_strided_slice %349 {offsets = [0, 0], sizes = [2, 32], strides = [1, 1]} : vector<2x128xf32> to vector<2x32xf32>
    %cst_173 = arith.constant 5.000000e-01 : f32
    %351 = vector.broadcast %cst_173 : f32 to vector<2x32xf32>
    %352 = arith.mulf %351, %350 : vector<2x32xf32>
    %353 = math.tanh %352 : vector<2x32xf32>
    %cst_174 = arith.constant 1.000000e+00 : f32
    %354 = vector.broadcast %cst_174 : f32 to vector<2x32xf32>
    %355 = arith.addf %353, %354 : vector<2x32xf32>
    %cst_175 = arith.constant 5.000000e-01 : f32
    %356 = vector.broadcast %cst_175 : f32 to vector<2x32xf32>
    %357 = arith.mulf %356, %355 : vector<2x32xf32>
    %358 = vector.extract_strided_slice %349 {offsets = [0, 32], sizes = [2, 32], strides = [1, 1]} : vector<2x128xf32> to vector<2x32xf32>
    %cst_176 = arith.constant 5.000000e-01 : f32
    %359 = vector.broadcast %cst_176 : f32 to vector<2x32xf32>
    %360 = arith.mulf %359, %358 : vector<2x32xf32>
    %361 = math.tanh %360 : vector<2x32xf32>
    %cst_177 = arith.constant 1.000000e+00 : f32
    %362 = vector.broadcast %cst_177 : f32 to vector<2x32xf32>
    %363 = arith.addf %361, %362 : vector<2x32xf32>
    %cst_178 = arith.constant 5.000000e-01 : f32
    %364 = vector.broadcast %cst_178 : f32 to vector<2x32xf32>
    %365 = arith.mulf %364, %363 : vector<2x32xf32>
    %366 = vector.extract_strided_slice %349 {offsets = [0, 64], sizes = [2, 32], strides = [1, 1]} : vector<2x128xf32> to vector<2x32xf32>
    %367 = math.tanh %366 : vector<2x32xf32>
    %368 = vector.extract_strided_slice %349 {offsets = [0, 96], sizes = [2, 32], strides = [1, 1]} : vector<2x128xf32> to vector<2x32xf32>
    %cst_179 = arith.constant 5.000000e-01 : f32
    %369 = vector.broadcast %cst_179 : f32 to vector<2x32xf32>
    %370 = arith.mulf %369, %368 : vector<2x32xf32>
    %371 = math.tanh %370 : vector<2x32xf32>
    %cst_180 = arith.constant 1.000000e+00 : f32
    %372 = vector.broadcast %cst_180 : f32 to vector<2x32xf32>
    %373 = arith.addf %371, %372 : vector<2x32xf32>
    %cst_181 = arith.constant 5.000000e-01 : f32
    %374 = vector.broadcast %cst_181 : f32 to vector<2x32xf32>
    %375 = arith.mulf %374, %373 : vector<2x32xf32>
    %376 = arith.mulf %365, %345 : vector<2x32xf32>
    %377 = arith.mulf %357, %367 : vector<2x32xf32>
    %378 = arith.addf %376, %377 : vector<2x32xf32>
    %379 = math.tanh %378 : vector<2x32xf32>
    %380 = arith.mulf %375, %379 : vector<2x32xf32>
    %c1_182 = arith.constant 1 : index
    %c0_183 = arith.constant 0 : index
    %c0_184 = arith.constant 0 : index
    %381 = vector.load %arg13[%c1_182, %c0_183, %c0_184] : memref<8x2x128xf32, #tpu.memory_space<vmem>>, vector<1x2x128xf32>
    %382 = vector.shape_cast %381 : vector<1x2x128xf32> to vector<2x128xf32>
    %cst_185 = arith.constant dense<0.000000e+00> : vector<2x128xf32>
    %383 = tpu.matmul %380, %341, %cst_185 {dimension_numbers = #tpu.dot_dimension_numbers<[1], [0], [0], [1], [0, 0, 1, 1], [], []>} : vector<2x32xf32>, vector<32x128xf32>, vector<2x128xf32> -> vector<2x128xf32>
    %384 = arith.addf %382, %383 : vector<2x128xf32>
    %385 = vector.extract_strided_slice %384 {offsets = [0, 0], sizes = [2, 32], strides = [1, 1]} : vector<2x128xf32> to vector<2x32xf32>
    %cst_186 = arith.constant 5.000000e-01 : f32
    %386 = vector.broadcast %cst_186 : f32 to vector<2x32xf32>
    %387 = arith.mulf %386, %385 : vector<2x32xf32>
    %388 = math.tanh %387 : vector<2x32xf32>
    %cst_187 = arith.constant 1.000000e+00 : f32
    %389 = vector.broadcast %cst_187 : f32 to vector<2x32xf32>
    %390 = arith.addf %388, %389 : vector<2x32xf32>
    %cst_188 = arith.constant 5.000000e-01 : f32
    %391 = vector.broadcast %cst_188 : f32 to vector<2x32xf32>
    %392 = arith.mulf %391, %390 : vector<2x32xf32>
    %393 = vector.extract_strided_slice %384 {offsets = [0, 32], sizes = [2, 32], strides = [1, 1]} : vector<2x128xf32> to vector<2x32xf32>
    %cst_189 = arith.constant 5.000000e-01 : f32
    %394 = vector.broadcast %cst_189 : f32 to vector<2x32xf32>
    %395 = arith.mulf %394, %393 : vector<2x32xf32>
    %396 = math.tanh %395 : vector<2x32xf32>
    %cst_190 = arith.constant 1.000000e+00 : f32
    %397 = vector.broadcast %cst_190 : f32 to vector<2x32xf32>
    %398 = arith.addf %396, %397 : vector<2x32xf32>
    %cst_191 = arith.constant 5.000000e-01 : f32
    %399 = vector.broadcast %cst_191 : f32 to vector<2x32xf32>
    %400 = arith.mulf %399, %398 : vector<2x32xf32>
    %401 = vector.extract_strided_slice %384 {offsets = [0, 64], sizes = [2, 32], strides = [1, 1]} : vector<2x128xf32> to vector<2x32xf32>
    %402 = math.tanh %401 : vector<2x32xf32>
    %403 = vector.extract_strided_slice %384 {offsets = [0, 96], sizes = [2, 32], strides = [1, 1]} : vector<2x128xf32> to vector<2x32xf32>
    %cst_192 = arith.constant 5.000000e-01 : f32
    %404 = vector.broadcast %cst_192 : f32 to vector<2x32xf32>
    %405 = arith.mulf %404, %403 : vector<2x32xf32>
    %406 = math.tanh %405 : vector<2x32xf32>
    %cst_193 = arith.constant 1.000000e+00 : f32
    %407 = vector.broadcast %cst_193 : f32 to vector<2x32xf32>
    %408 = arith.addf %406, %407 : vector<2x32xf32>
    %cst_194 = arith.constant 5.000000e-01 : f32
    %409 = vector.broadcast %cst_194 : f32 to vector<2x32xf32>
    %410 = arith.mulf %409, %408 : vector<2x32xf32>
    %411 = arith.mulf %400, %378 : vector<2x32xf32>
    %412 = arith.mulf %392, %402 : vector<2x32xf32>
    %413 = arith.addf %411, %412 : vector<2x32xf32>
    %414 = math.tanh %413 : vector<2x32xf32>
    %415 = arith.mulf %410, %414 : vector<2x32xf32>
    %c2_195 = arith.constant 2 : index
    %c0_196 = arith.constant 0 : index
    %c0_197 = arith.constant 0 : index
    %416 = vector.load %arg13[%c2_195, %c0_196, %c0_197] : memref<8x2x128xf32, #tpu.memory_space<vmem>>, vector<1x2x128xf32>
    %417 = vector.shape_cast %416 : vector<1x2x128xf32> to vector<2x128xf32>
    %cst_198 = arith.constant dense<0.000000e+00> : vector<2x128xf32>
    %418 = tpu.matmul %415, %341, %cst_198 {dimension_numbers = #tpu.dot_dimension_numbers<[1], [0], [0], [1], [0, 0, 1, 1], [], []>} : vector<2x32xf32>, vector<32x128xf32>, vector<2x128xf32> -> vector<2x128xf32>
    %419 = arith.addf %417, %418 : vector<2x128xf32>
    %420 = vector.extract_strided_slice %419 {offsets = [0, 0], sizes = [2, 32], strides = [1, 1]} : vector<2x128xf32> to vector<2x32xf32>
    %cst_199 = arith.constant 5.000000e-01 : f32
    %421 = vector.broadcast %cst_199 : f32 to vector<2x32xf32>
    %422 = arith.mulf %421, %420 : vector<2x32xf32>
    %423 = math.tanh %422 : vector<2x32xf32>
    %cst_200 = arith.constant 1.000000e+00 : f32
    %424 = vector.broadcast %cst_200 : f32 to vector<2x32xf32>
    %425 = arith.addf %423, %424 : vector<2x32xf32>
    %cst_201 = arith.constant 5.000000e-01 : f32
    %426 = vector.broadcast %cst_201 : f32 to vector<2x32xf32>
    %427 = arith.mulf %426, %425 : vector<2x32xf32>
    %428 = vector.extract_strided_slice %419 {offsets = [0, 32], sizes = [2, 32], strides = [1, 1]} : vector<2x128xf32> to vector<2x32xf32>
    %cst_202 = arith.constant 5.000000e-01 : f32
    %429 = vector.broadcast %cst_202 : f32 to vector<2x32xf32>
    %430 = arith.mulf %429, %428 : vector<2x32xf32>
    %431 = math.tanh %430 : vector<2x32xf32>
    %cst_203 = arith.constant 1.000000e+00 : f32
    %432 = vector.broadcast %cst_203 : f32 to vector<2x32xf32>
    %433 = arith.addf %431, %432 : vector<2x32xf32>
    %cst_204 = arith.constant 5.000000e-01 : f32
    %434 = vector.broadcast %cst_204 : f32 to vector<2x32xf32>
    %435 = arith.mulf %434, %433 : vector<2x32xf32>
    %436 = vector.extract_strided_slice %419 {offsets = [0, 64], sizes = [2, 32], strides = [1, 1]} : vector<2x128xf32> to vector<2x32xf32>
    %437 = math.tanh %436 : vector<2x32xf32>
    %438 = vector.extract_strided_slice %419 {offsets = [0, 96], sizes = [2, 32], strides = [1, 1]} : vector<2x128xf32> to vector<2x32xf32>
    %cst_205 = arith.constant 5.000000e-01 : f32
    %439 = vector.broadcast %cst_205 : f32 to vector<2x32xf32>
    %440 = arith.mulf %439, %438 : vector<2x32xf32>
    %441 = math.tanh %440 : vector<2x32xf32>
    %cst_206 = arith.constant 1.000000e+00 : f32
    %442 = vector.broadcast %cst_206 : f32 to vector<2x32xf32>
    %443 = arith.addf %441, %442 : vector<2x32xf32>
    %cst_207 = arith.constant 5.000000e-01 : f32
    %444 = vector.broadcast %cst_207 : f32 to vector<2x32xf32>
    %445 = arith.mulf %444, %443 : vector<2x32xf32>
    %446 = arith.mulf %435, %413 : vector<2x32xf32>
    %447 = arith.mulf %427, %437 : vector<2x32xf32>
    %448 = arith.addf %446, %447 : vector<2x32xf32>
    %449 = math.tanh %448 : vector<2x32xf32>
    %450 = arith.mulf %445, %449 : vector<2x32xf32>
    %c3_208 = arith.constant 3 : index
    %c0_209 = arith.constant 0 : index
    %c0_210 = arith.constant 0 : index
    %451 = vector.load %arg13[%c3_208, %c0_209, %c0_210] : memref<8x2x128xf32, #tpu.memory_space<vmem>>, vector<1x2x128xf32>
    %452 = vector.shape_cast %451 : vector<1x2x128xf32> to vector<2x128xf32>
    %cst_211 = arith.constant dense<0.000000e+00> : vector<2x128xf32>
    %453 = tpu.matmul %450, %341, %cst_211 {dimension_numbers = #tpu.dot_dimension_numbers<[1], [0], [0], [1], [0, 0, 1, 1], [], []>} : vector<2x32xf32>, vector<32x128xf32>, vector<2x128xf32> -> vector<2x128xf32>
    %454 = arith.addf %452, %453 : vector<2x128xf32>
    %455 = vector.extract_strided_slice %454 {offsets = [0, 0], sizes = [2, 32], strides = [1, 1]} : vector<2x128xf32> to vector<2x32xf32>
    %cst_212 = arith.constant 5.000000e-01 : f32
    %456 = vector.broadcast %cst_212 : f32 to vector<2x32xf32>
    %457 = arith.mulf %456, %455 : vector<2x32xf32>
    %458 = math.tanh %457 : vector<2x32xf32>
    %cst_213 = arith.constant 1.000000e+00 : f32
    %459 = vector.broadcast %cst_213 : f32 to vector<2x32xf32>
    %460 = arith.addf %458, %459 : vector<2x32xf32>
    %cst_214 = arith.constant 5.000000e-01 : f32
    %461 = vector.broadcast %cst_214 : f32 to vector<2x32xf32>
    %462 = arith.mulf %461, %460 : vector<2x32xf32>
    %463 = vector.extract_strided_slice %454 {offsets = [0, 32], sizes = [2, 32], strides = [1, 1]} : vector<2x128xf32> to vector<2x32xf32>
    %cst_215 = arith.constant 5.000000e-01 : f32
    %464 = vector.broadcast %cst_215 : f32 to vector<2x32xf32>
    %465 = arith.mulf %464, %463 : vector<2x32xf32>
    %466 = math.tanh %465 : vector<2x32xf32>
    %cst_216 = arith.constant 1.000000e+00 : f32
    %467 = vector.broadcast %cst_216 : f32 to vector<2x32xf32>
    %468 = arith.addf %466, %467 : vector<2x32xf32>
    %cst_217 = arith.constant 5.000000e-01 : f32
    %469 = vector.broadcast %cst_217 : f32 to vector<2x32xf32>
    %470 = arith.mulf %469, %468 : vector<2x32xf32>
    %471 = vector.extract_strided_slice %454 {offsets = [0, 64], sizes = [2, 32], strides = [1, 1]} : vector<2x128xf32> to vector<2x32xf32>
    %472 = math.tanh %471 : vector<2x32xf32>
    %473 = vector.extract_strided_slice %454 {offsets = [0, 96], sizes = [2, 32], strides = [1, 1]} : vector<2x128xf32> to vector<2x32xf32>
    %cst_218 = arith.constant 5.000000e-01 : f32
    %474 = vector.broadcast %cst_218 : f32 to vector<2x32xf32>
    %475 = arith.mulf %474, %473 : vector<2x32xf32>
    %476 = math.tanh %475 : vector<2x32xf32>
    %cst_219 = arith.constant 1.000000e+00 : f32
    %477 = vector.broadcast %cst_219 : f32 to vector<2x32xf32>
    %478 = arith.addf %476, %477 : vector<2x32xf32>
    %cst_220 = arith.constant 5.000000e-01 : f32
    %479 = vector.broadcast %cst_220 : f32 to vector<2x32xf32>
    %480 = arith.mulf %479, %478 : vector<2x32xf32>
    %481 = arith.mulf %470, %448 : vector<2x32xf32>
    %482 = arith.mulf %462, %472 : vector<2x32xf32>
    %483 = arith.addf %481, %482 : vector<2x32xf32>
    %484 = math.tanh %483 : vector<2x32xf32>
    %485 = arith.mulf %480, %484 : vector<2x32xf32>
    %c4_221 = arith.constant 4 : index
    %c0_222 = arith.constant 0 : index
    %c0_223 = arith.constant 0 : index
    %486 = vector.load %arg13[%c4_221, %c0_222, %c0_223] : memref<8x2x128xf32, #tpu.memory_space<vmem>>, vector<1x2x128xf32>
    %487 = vector.shape_cast %486 : vector<1x2x128xf32> to vector<2x128xf32>
    %cst_224 = arith.constant dense<0.000000e+00> : vector<2x128xf32>
    %488 = tpu.matmul %485, %341, %cst_224 {dimension_numbers = #tpu.dot_dimension_numbers<[1], [0], [0], [1], [0, 0, 1, 1], [], []>} : vector<2x32xf32>, vector<32x128xf32>, vector<2x128xf32> -> vector<2x128xf32>
    %489 = arith.addf %487, %488 : vector<2x128xf32>
    %490 = vector.extract_strided_slice %489 {offsets = [0, 0], sizes = [2, 32], strides = [1, 1]} : vector<2x128xf32> to vector<2x32xf32>
    %cst_225 = arith.constant 5.000000e-01 : f32
    %491 = vector.broadcast %cst_225 : f32 to vector<2x32xf32>
    %492 = arith.mulf %491, %490 : vector<2x32xf32>
    %493 = math.tanh %492 : vector<2x32xf32>
    %cst_226 = arith.constant 1.000000e+00 : f32
    %494 = vector.broadcast %cst_226 : f32 to vector<2x32xf32>
    %495 = arith.addf %493, %494 : vector<2x32xf32>
    %cst_227 = arith.constant 5.000000e-01 : f32
    %496 = vector.broadcast %cst_227 : f32 to vector<2x32xf32>
    %497 = arith.mulf %496, %495 : vector<2x32xf32>
    %498 = vector.extract_strided_slice %489 {offsets = [0, 32], sizes = [2, 32], strides = [1, 1]} : vector<2x128xf32> to vector<2x32xf32>
    %cst_228 = arith.constant 5.000000e-01 : f32
    %499 = vector.broadcast %cst_228 : f32 to vector<2x32xf32>
    %500 = arith.mulf %499, %498 : vector<2x32xf32>
    %501 = math.tanh %500 : vector<2x32xf32>
    %cst_229 = arith.constant 1.000000e+00 : f32
    %502 = vector.broadcast %cst_229 : f32 to vector<2x32xf32>
    %503 = arith.addf %501, %502 : vector<2x32xf32>
    %cst_230 = arith.constant 5.000000e-01 : f32
    %504 = vector.broadcast %cst_230 : f32 to vector<2x32xf32>
    %505 = arith.mulf %504, %503 : vector<2x32xf32>
    %506 = vector.extract_strided_slice %489 {offsets = [0, 64], sizes = [2, 32], strides = [1, 1]} : vector<2x128xf32> to vector<2x32xf32>
    %507 = math.tanh %506 : vector<2x32xf32>
    %508 = vector.extract_strided_slice %489 {offsets = [0, 96], sizes = [2, 32], strides = [1, 1]} : vector<2x128xf32> to vector<2x32xf32>
    %cst_231 = arith.constant 5.000000e-01 : f32
    %509 = vector.broadcast %cst_231 : f32 to vector<2x32xf32>
    %510 = arith.mulf %509, %508 : vector<2x32xf32>
    %511 = math.tanh %510 : vector<2x32xf32>
    %cst_232 = arith.constant 1.000000e+00 : f32
    %512 = vector.broadcast %cst_232 : f32 to vector<2x32xf32>
    %513 = arith.addf %511, %512 : vector<2x32xf32>
    %cst_233 = arith.constant 5.000000e-01 : f32
    %514 = vector.broadcast %cst_233 : f32 to vector<2x32xf32>
    %515 = arith.mulf %514, %513 : vector<2x32xf32>
    %516 = arith.mulf %505, %483 : vector<2x32xf32>
    %517 = arith.mulf %497, %507 : vector<2x32xf32>
    %518 = arith.addf %516, %517 : vector<2x32xf32>
    %519 = math.tanh %518 : vector<2x32xf32>
    %520 = arith.mulf %515, %519 : vector<2x32xf32>
    %c5_234 = arith.constant 5 : index
    %c0_235 = arith.constant 0 : index
    %c0_236 = arith.constant 0 : index
    %521 = vector.load %arg13[%c5_234, %c0_235, %c0_236] : memref<8x2x128xf32, #tpu.memory_space<vmem>>, vector<1x2x128xf32>
    %522 = vector.shape_cast %521 : vector<1x2x128xf32> to vector<2x128xf32>
    %cst_237 = arith.constant dense<0.000000e+00> : vector<2x128xf32>
    %523 = tpu.matmul %520, %341, %cst_237 {dimension_numbers = #tpu.dot_dimension_numbers<[1], [0], [0], [1], [0, 0, 1, 1], [], []>} : vector<2x32xf32>, vector<32x128xf32>, vector<2x128xf32> -> vector<2x128xf32>
    %524 = arith.addf %522, %523 : vector<2x128xf32>
    %525 = vector.extract_strided_slice %524 {offsets = [0, 0], sizes = [2, 32], strides = [1, 1]} : vector<2x128xf32> to vector<2x32xf32>
    %cst_238 = arith.constant 5.000000e-01 : f32
    %526 = vector.broadcast %cst_238 : f32 to vector<2x32xf32>
    %527 = arith.mulf %526, %525 : vector<2x32xf32>
    %528 = math.tanh %527 : vector<2x32xf32>
    %cst_239 = arith.constant 1.000000e+00 : f32
    %529 = vector.broadcast %cst_239 : f32 to vector<2x32xf32>
    %530 = arith.addf %528, %529 : vector<2x32xf32>
    %cst_240 = arith.constant 5.000000e-01 : f32
    %531 = vector.broadcast %cst_240 : f32 to vector<2x32xf32>
    %532 = arith.mulf %531, %530 : vector<2x32xf32>
    %533 = vector.extract_strided_slice %524 {offsets = [0, 32], sizes = [2, 32], strides = [1, 1]} : vector<2x128xf32> to vector<2x32xf32>
    %cst_241 = arith.constant 5.000000e-01 : f32
    %534 = vector.broadcast %cst_241 : f32 to vector<2x32xf32>
    %535 = arith.mulf %534, %533 : vector<2x32xf32>
    %536 = math.tanh %535 : vector<2x32xf32>
    %cst_242 = arith.constant 1.000000e+00 : f32
    %537 = vector.broadcast %cst_242 : f32 to vector<2x32xf32>
    %538 = arith.addf %536, %537 : vector<2x32xf32>
    %cst_243 = arith.constant 5.000000e-01 : f32
    %539 = vector.broadcast %cst_243 : f32 to vector<2x32xf32>
    %540 = arith.mulf %539, %538 : vector<2x32xf32>
    %541 = vector.extract_strided_slice %524 {offsets = [0, 64], sizes = [2, 32], strides = [1, 1]} : vector<2x128xf32> to vector<2x32xf32>
    %542 = math.tanh %541 : vector<2x32xf32>
    %543 = vector.extract_strided_slice %524 {offsets = [0, 96], sizes = [2, 32], strides = [1, 1]} : vector<2x128xf32> to vector<2x32xf32>
    %cst_244 = arith.constant 5.000000e-01 : f32
    %544 = vector.broadcast %cst_244 : f32 to vector<2x32xf32>
    %545 = arith.mulf %544, %543 : vector<2x32xf32>
    %546 = math.tanh %545 : vector<2x32xf32>
    %cst_245 = arith.constant 1.000000e+00 : f32
    %547 = vector.broadcast %cst_245 : f32 to vector<2x32xf32>
    %548 = arith.addf %546, %547 : vector<2x32xf32>
    %cst_246 = arith.constant 5.000000e-01 : f32
    %549 = vector.broadcast %cst_246 : f32 to vector<2x32xf32>
    %550 = arith.mulf %549, %548 : vector<2x32xf32>
    %551 = arith.mulf %540, %518 : vector<2x32xf32>
    %552 = arith.mulf %532, %542 : vector<2x32xf32>
    %553 = arith.addf %551, %552 : vector<2x32xf32>
    %554 = math.tanh %553 : vector<2x32xf32>
    %555 = arith.mulf %550, %554 : vector<2x32xf32>
    %c6_247 = arith.constant 6 : index
    %c0_248 = arith.constant 0 : index
    %c0_249 = arith.constant 0 : index
    %556 = vector.load %arg13[%c6_247, %c0_248, %c0_249] : memref<8x2x128xf32, #tpu.memory_space<vmem>>, vector<1x2x128xf32>
    %557 = vector.shape_cast %556 : vector<1x2x128xf32> to vector<2x128xf32>
    %cst_250 = arith.constant dense<0.000000e+00> : vector<2x128xf32>
    %558 = tpu.matmul %555, %341, %cst_250 {dimension_numbers = #tpu.dot_dimension_numbers<[1], [0], [0], [1], [0, 0, 1, 1], [], []>} : vector<2x32xf32>, vector<32x128xf32>, vector<2x128xf32> -> vector<2x128xf32>
    %559 = arith.addf %557, %558 : vector<2x128xf32>
    %560 = vector.extract_strided_slice %559 {offsets = [0, 0], sizes = [2, 32], strides = [1, 1]} : vector<2x128xf32> to vector<2x32xf32>
    %cst_251 = arith.constant 5.000000e-01 : f32
    %561 = vector.broadcast %cst_251 : f32 to vector<2x32xf32>
    %562 = arith.mulf %561, %560 : vector<2x32xf32>
    %563 = math.tanh %562 : vector<2x32xf32>
    %cst_252 = arith.constant 1.000000e+00 : f32
    %564 = vector.broadcast %cst_252 : f32 to vector<2x32xf32>
    %565 = arith.addf %563, %564 : vector<2x32xf32>
    %cst_253 = arith.constant 5.000000e-01 : f32
    %566 = vector.broadcast %cst_253 : f32 to vector<2x32xf32>
    %567 = arith.mulf %566, %565 : vector<2x32xf32>
    %568 = vector.extract_strided_slice %559 {offsets = [0, 32], sizes = [2, 32], strides = [1, 1]} : vector<2x128xf32> to vector<2x32xf32>
    %cst_254 = arith.constant 5.000000e-01 : f32
    %569 = vector.broadcast %cst_254 : f32 to vector<2x32xf32>
    %570 = arith.mulf %569, %568 : vector<2x32xf32>
    %571 = math.tanh %570 : vector<2x32xf32>
    %cst_255 = arith.constant 1.000000e+00 : f32
    %572 = vector.broadcast %cst_255 : f32 to vector<2x32xf32>
    %573 = arith.addf %571, %572 : vector<2x32xf32>
    %cst_256 = arith.constant 5.000000e-01 : f32
    %574 = vector.broadcast %cst_256 : f32 to vector<2x32xf32>
    %575 = arith.mulf %574, %573 : vector<2x32xf32>
    %576 = vector.extract_strided_slice %559 {offsets = [0, 64], sizes = [2, 32], strides = [1, 1]} : vector<2x128xf32> to vector<2x32xf32>
    %577 = math.tanh %576 : vector<2x32xf32>
    %578 = vector.extract_strided_slice %559 {offsets = [0, 96], sizes = [2, 32], strides = [1, 1]} : vector<2x128xf32> to vector<2x32xf32>
    %cst_257 = arith.constant 5.000000e-01 : f32
    %579 = vector.broadcast %cst_257 : f32 to vector<2x32xf32>
    %580 = arith.mulf %579, %578 : vector<2x32xf32>
    %581 = math.tanh %580 : vector<2x32xf32>
    %cst_258 = arith.constant 1.000000e+00 : f32
    %582 = vector.broadcast %cst_258 : f32 to vector<2x32xf32>
    %583 = arith.addf %581, %582 : vector<2x32xf32>
    %cst_259 = arith.constant 5.000000e-01 : f32
    %584 = vector.broadcast %cst_259 : f32 to vector<2x32xf32>
    %585 = arith.mulf %584, %583 : vector<2x32xf32>
    %586 = arith.mulf %575, %553 : vector<2x32xf32>
    %587 = arith.mulf %567, %577 : vector<2x32xf32>
    %588 = arith.addf %586, %587 : vector<2x32xf32>
    %589 = math.tanh %588 : vector<2x32xf32>
    %590 = arith.mulf %585, %589 : vector<2x32xf32>
    %c7_260 = arith.constant 7 : index
    %c0_261 = arith.constant 0 : index
    %c0_262 = arith.constant 0 : index
    %591 = vector.load %arg13[%c7_260, %c0_261, %c0_262] : memref<8x2x128xf32, #tpu.memory_space<vmem>>, vector<1x2x128xf32>
    %592 = vector.shape_cast %591 : vector<1x2x128xf32> to vector<2x128xf32>
    %cst_263 = arith.constant dense<0.000000e+00> : vector<2x128xf32>
    %593 = tpu.matmul %590, %341, %cst_263 {dimension_numbers = #tpu.dot_dimension_numbers<[1], [0], [0], [1], [0, 0, 1, 1], [], []>} : vector<2x32xf32>, vector<32x128xf32>, vector<2x128xf32> -> vector<2x128xf32>
    %594 = arith.addf %592, %593 : vector<2x128xf32>
    %595 = vector.extract_strided_slice %594 {offsets = [0, 0], sizes = [2, 32], strides = [1, 1]} : vector<2x128xf32> to vector<2x32xf32>
    %cst_264 = arith.constant 5.000000e-01 : f32
    %596 = vector.broadcast %cst_264 : f32 to vector<2x32xf32>
    %597 = arith.mulf %596, %595 : vector<2x32xf32>
    %598 = math.tanh %597 : vector<2x32xf32>
    %cst_265 = arith.constant 1.000000e+00 : f32
    %599 = vector.broadcast %cst_265 : f32 to vector<2x32xf32>
    %600 = arith.addf %598, %599 : vector<2x32xf32>
    %cst_266 = arith.constant 5.000000e-01 : f32
    %601 = vector.broadcast %cst_266 : f32 to vector<2x32xf32>
    %602 = arith.mulf %601, %600 : vector<2x32xf32>
    %603 = vector.extract_strided_slice %594 {offsets = [0, 32], sizes = [2, 32], strides = [1, 1]} : vector<2x128xf32> to vector<2x32xf32>
    %cst_267 = arith.constant 5.000000e-01 : f32
    %604 = vector.broadcast %cst_267 : f32 to vector<2x32xf32>
    %605 = arith.mulf %604, %603 : vector<2x32xf32>
    %606 = math.tanh %605 : vector<2x32xf32>
    %cst_268 = arith.constant 1.000000e+00 : f32
    %607 = vector.broadcast %cst_268 : f32 to vector<2x32xf32>
    %608 = arith.addf %606, %607 : vector<2x32xf32>
    %cst_269 = arith.constant 5.000000e-01 : f32
    %609 = vector.broadcast %cst_269 : f32 to vector<2x32xf32>
    %610 = arith.mulf %609, %608 : vector<2x32xf32>
    %611 = vector.extract_strided_slice %594 {offsets = [0, 64], sizes = [2, 32], strides = [1, 1]} : vector<2x128xf32> to vector<2x32xf32>
    %612 = math.tanh %611 : vector<2x32xf32>
    %613 = vector.extract_strided_slice %594 {offsets = [0, 96], sizes = [2, 32], strides = [1, 1]} : vector<2x128xf32> to vector<2x32xf32>
    %cst_270 = arith.constant 5.000000e-01 : f32
    %614 = vector.broadcast %cst_270 : f32 to vector<2x32xf32>
    %615 = arith.mulf %614, %613 : vector<2x32xf32>
    %616 = math.tanh %615 : vector<2x32xf32>
    %cst_271 = arith.constant 1.000000e+00 : f32
    %617 = vector.broadcast %cst_271 : f32 to vector<2x32xf32>
    %618 = arith.addf %616, %617 : vector<2x32xf32>
    %cst_272 = arith.constant 5.000000e-01 : f32
    %619 = vector.broadcast %cst_272 : f32 to vector<2x32xf32>
    %620 = arith.mulf %619, %618 : vector<2x32xf32>
    %621 = arith.mulf %610, %588 : vector<2x32xf32>
    %622 = arith.mulf %602, %612 : vector<2x32xf32>
    %623 = arith.addf %621, %622 : vector<2x32xf32>
    %624 = math.tanh %623 : vector<2x32xf32>
    %625 = arith.mulf %620, %624 : vector<2x32xf32>
    %c1_273 = arith.constant 1 : index
    %c0_274 = arith.constant 0 : index
    %c0_275 = arith.constant 0 : index
    %626 = vector.load %arg10[%c1_273, %c0_274, %c0_275] : memref<2x2x32xf32, #tpu.memory_space<vmem>>, vector<1x2x32xf32>
    %627 = vector.shape_cast %626 : vector<1x2x32xf32> to vector<2x32xf32>
    %628 = vector.shape_cast %625 : vector<2x32xf32> to vector<1x2x32xf32>
    tpu.vector_store %arg10[%c1_273, %c0_274, %c0_275], %628 {strides = array<i32>} : memref<2x2x32xf32, #tpu.memory_space<vmem>>, vector<1x2x32xf32>,
    %c1_276 = arith.constant 1 : index
    %c0_277 = arith.constant 0 : index
    %c0_278 = arith.constant 0 : index
    %629 = vector.load %arg11[%c1_276, %c0_277, %c0_278] : memref<2x2x32xf32, #tpu.memory_space<vmem>>, vector<1x2x32xf32>
    %630 = vector.shape_cast %629 : vector<1x2x32xf32> to vector<2x32xf32>
    %631 = vector.shape_cast %623 : vector<2x32xf32> to vector<1x2x32xf32>
    tpu.vector_store %arg11[%c1_276, %c0_277, %c0_278], %631 {strides = array<i32>} : memref<2x2x32xf32, #tpu.memory_space<vmem>>, vector<1x2x32xf32>,
    %c0_i32_279 = arith.constant 0 : i32
    %632 = arith.cmpi eq, %arg1, %c0_i32_279 : i32
    %633 = arith.extui %632 : i1 to i32
    %c0_i32_280 = arith.constant 0 : i32
    %634 = arith.cmpi ne, %633, %c0_i32_280 : i32
    scf.if %634 {
      %c1_281 = arith.constant 1 : index
      %c0_282 = arith.constant 0 : index
      %c0_283 = arith.constant 0 : index
      %635 = vector.load %arg10[%c1_281, %c0_282, %c0_283] : memref<2x2x32xf32, #tpu.memory_space<vmem>>, vector<1x2x32xf32>
      %636 = vector.shape_cast %635 : vector<1x2x32xf32> to vector<2x32xf32>
      %c0_284 = arith.constant 0 : index
      %c0_285 = arith.constant 0 : index
      %637 = vector.load %arg7[%c0_284, %c0_285] : memref<32x8xf32, #tpu.memory_space<vmem>>, vector<32x8xf32>
      %cst_286 = arith.constant dense<0.000000e+00> : vector<2x8xf32>
      %638 = tpu.matmul %636, %637, %cst_286 {dimension_numbers = #tpu.dot_dimension_numbers<[1], [0], [0], [1], [0, 0, 1, 1], [], []>} : vector<2x32xf32>, vector<32x8xf32>, vector<2x8xf32> -> vector<2x8xf32>
      %c0_287 = arith.constant 0 : index
      %c0_288 = arith.constant 0 : index
      %639 = vector.load %arg8[%c0_287, %c0_288] : memref<1x8xf32, #tpu.memory_space<vmem>>, vector<1x8xf32>
      %640 = vector.broadcast %639 : vector<1x8xf32> to vector<2x8xf32>
      %641 = arith.addf %638, %640 : vector<2x8xf32>
      %c0_289 = arith.constant 0 : index
      %c0_290 = arith.constant 0 : index
      %642 = vector.load %arg9[%c0_289, %c0_290] : memref<2x8xf32, #tpu.memory_space<vmem>>, vector<2x8xf32>
      tpu.vector_store %arg9[%c0_289, %c0_290], %641 {strides = array<i32>} : memref<2x8xf32, #tpu.memory_space<vmem>>, vector<2x8xf32>,
    } else {
    }
    return
  }
  func.func @transform_0(%arg0: i32, %arg1: i32) -> (i32, i32, i32) {
    %c0_i32 = arith.constant 0 : i32
    %c0_i32_0 = arith.constant 0 : i32
    return %arg1, %arg0, %c0_i32 : i32, i32, i32
  }
  func.func @transform_1(%arg0: i32, %arg1: i32) -> (i32, i32) {
    %c0_i32 = arith.constant 0 : i32
    %c0_i32_0 = arith.constant 0 : i32
    %c0_i32_1 = arith.constant 0 : i32
    return %c0_i32, %c0_i32_0 : i32, i32
  }
  func.func @transform_2(%arg0: i32, %arg1: i32) -> (i32, i32, i32) {
    %c0_i32 = arith.constant 0 : i32
    %c0_i32_0 = arith.constant 0 : i32
    %c0_i32_1 = arith.constant 0 : i32
    %c0_i32_2 = arith.constant 0 : i32
    return %c0_i32, %c0_i32_0, %c0_i32_1 : i32, i32, i32
  }
  func.func @transform_3(%arg0: i32, %arg1: i32) -> (i32, i32, i32) {
    %c0_i32 = arith.constant 0 : i32
    %c0_i32_0 = arith.constant 0 : i32
    %c0_i32_1 = arith.constant 0 : i32
    %c0_i32_2 = arith.constant 0 : i32
    return %c0_i32, %c0_i32_0, %c0_i32_1 : i32, i32, i32
  }
  func.func @transform_4(%arg0: i32, %arg1: i32) -> (i32, i32, i32) {
    %c0_i32 = arith.constant 0 : i32
    %c0_i32_0 = arith.constant 0 : i32
    %c0_i32_1 = arith.constant 0 : i32
    %c0_i32_2 = arith.constant 0 : i32
    return %c0_i32, %c0_i32_0, %c0_i32_1 : i32, i32, i32
  }
  func.func @transform_5(%arg0: i32, %arg1: i32) -> (i32, i32) {
    %c0_i32 = arith.constant 0 : i32
    %c0_i32_0 = arith.constant 0 : i32
    %c0_i32_1 = arith.constant 0 : i32
    return %c0_i32, %c0_i32_0 : i32, i32
  }
  func.func @transform_6(%arg0: i32, %arg1: i32) -> (i32, i32) {
    %c0_i32 = arith.constant 0 : i32
    %c0_i32_0 = arith.constant 0 : i32
    %c0_i32_1 = arith.constant 0 : i32
    return %c0_i32, %c0_i32_0 : i32, i32
  }
  func.func @transform_7(%arg0: i32, %arg1: i32) -> (i32, i32) {
    %c0_i32 = arith.constant 0 : i32
    %c0_i32_0 = arith.constant 0 : i32
    return %arg0, %c0_i32 : i32, i32
  }
}

</mosaic_0001>

<bundles_post_ra>
// kernel: tpu_custom_call.1
= control target key start
LH: loop header
LB: loop body
LE: loop exit
PB: predicated region body
PF: predicated region fallthrough
CT: control target
= control target key end

     0   :  { %12 = vsyncpa [#allocation7], 0  ;;  %s1671_s0 = inlined_call_operand.hbm [shape: f32[8,2,16], index: 0, kind: input, shape index: {}]   ;;  %s1672_s1 = inlined_call_operand.hbm [shape: f32[16,128], index: 1, kind: input, shape index: {}]   ;;  %s1673_s2 = inlined_call_operand.vmem [shape: f32[1,32,128], index: 2, kind: input, shape index: {}]   ;;  %s1674_s3 = inlined_call_operand.hbm [shape: f32[2,32,128], index: 3, kind: input, shape index: {}]   ;;  %s1675_s4 = inlined_call_operand.vmem [shape: f32[2,1,128], index: 4, kind: input, shape index: {}]   ;;  %s1676_s5 = inlined_call_operand.vmem [shape: f32[32,8], index: 5, kind: input, shape index: {}]   ;;  %s1677_s6 = inlined_call_operand.vmem [shape: f32[1,8], index: 6, kind: input, shape index: {}]   ;;  %s1678_s7 = inlined_call_operand.hbm [shape: f32[2,8], index: 7, kind: output, shape index: {}]  }
   0x1   :  { %13 = vsyncpa [#allocation10], 0  ;;  %s32_s26 = sshll.u32 %s1672_s1, 4  ;;  %s33_s26 = int_to_ptr.hbm [resolvable:$true] %s32_s26 }
   0x2   :  { %14 = vsyncpa [#allocation8], 0  ;;  %s1406_s27 = smov [#allocation9]   ;;  %s19_s8 = sshll.u32 %s1671_s0, 4  ;;  %s20_s8 = int_to_ptr.hbm [resolvable:$true] %s19_s8 }
   0x3   :  { %s34_s28 = sshll.u32 %s1406_s27, 4  ;;  %s1407_s9 = smov 128   ;;  %s35_s28 = int_to_ptr.vmem [resolvable:$true] %s34_s28 }
   0x4   :  { %s1408_s10 = smov 8   ;;  %s1409_s11 = smov [#allocation6]  }
   0x5   :  { %40 = dma.hbm_to_vmem [thread:$0]  %s33_s26, 256, %s35_s28, [#allocation10], %s1407_s9, %s1407_s9, %s1408_s10  }
   0x6   :  { %s21_s12 = sshll.u32 %s1409_s11, 4  ;;  %s1410_s13 = smov 32   ;;  %s22_s12 = int_to_ptr.vmem [resolvable:$true] %s21_s12 }
   0x7   :  { %s1411_s14 = smov 2   ;;  %s47_s16 = sshll.u32 %s1674_s3, 4  ;;  %s48_s16 = int_to_ptr.hbm [resolvable:$true] %s47_s16 }
   0x8   :  { %27 = dma.hbm_to_vmem [thread:$0]  %s20_s8, 256, %s22_s12, [#allocation7], %s1410_s13, %s1410_s13, %s1411_s14  }
   0x9   :  { %s1412_s17 = smov [#allocation11]  }
   0xa   :  { %s49_s18 = sshll.u32 %s1412_s17, 4  ;;  %s50_s18 = int_to_ptr.vmem [resolvable:$true] %s49_s18 }
   0xb   :  { %55 = dma.hbm_to_vmem [thread:$0]  %s48_s16, 1024, %s50_s18, [#allocation10], %s1407_s9, %s1407_s9, %s1408_s10  }
   0xc   :  { %1400 = dma.done.wait [#allocation7], 256  }
   0xd   :  { %1401 = vsyncadd [#allocation7], 4294967040 }
   0xe   :  { %1402 = dma.done.wait [#allocation10], 1280  }
   0xf   :  { %1403 = vsyncadd [#allocation10], 4294966016  ;;  %vm78_vm0 = vcmask 254976   ;;  %v1413_v0 = vmov 0.0   ;;  %v92_v1 = vld [vmem:[#allocation9 + $0x8] sm:$0xff]  ;;  %v91_v2 = vld [vmem:[#allocation9] sm:$0xff] }
  0x10   :  { %79 = vst.msk [vmem:[#allocation2] sm:$0x3] %vm78_vm0, %v1413_v0  ;;  %v83_v3 = vld [vmem:[#allocation6] sm:$0x3]  ;;  %141 = vmatpush.msra.mxu0 %v92_v1  ;;  %v84_v4 = vld [vmem:[#allocation6 + $0x2] sm:$0x3] }
  0x11   :  { %80 = vst.msk [vmem:[#allocation2 + $0x2] sm:$0x3] %vm78_vm0, %v1413_v0  ;;  %v85_v5 = vld [vmem:[#allocation6 + $0x4] sm:$0x3]  ;;  %v86_v6 = vld [vmem:[#allocation6 + $0x6] sm:$0x3] }
  0x12   :  { %81 = vst.msk [vmem:[#allocation3] sm:$0x3] %vm78_vm0, %v1413_v0  ;;  %v175_v7 = vld [vmem:[#allocation11 + $0x18] sm:$0xff]  ;;  %v174_v8 = vld [vmem:[#allocation11 + $0x10] sm:$0xff]  ;;  %142 = vmatpush.msra.mxu0 %v91_v2  ;;  %v173_v9 = vld [vmem:[#allocation11 + $0x8] sm:$0xff]  ;;  %vm179_vm1 = vcmask 261120  }
  0x13   :  { %82 = vst.msk [vmem:[#allocation3 + $0x2] sm:$0x3] %vm78_vm0, %v1413_v0  ;;  %195 = vmatpush.msra.mxu1 %v175_v7  ;;  %252 = vmatpush.msra.mxu2 %v175_v7  ;;  %v172_v10 = vld [vmem:[#allocation11] sm:$0xff]  ;;  %vm122_vm2 = vcmask 130048   ;;  %v1477_v13 = vld [vmem:[%s1675_s4] ss:$0 sm:$0xff] }
  0x14   :  { %105 = vst [vmem:[#allocation1] ss:$4 sm:$0xff] %v83_v3  ;;  %305 = vmatpush.msra.mxu3 %v175_v7  ;;  %517 = vmatpush.msrb.mxu0 %v175_v7  ;;  %s1414_s19 = smov 64   ;;  %s1416_s15 = smov [#allocation12]   ;;  %vm1152_vm3 = vcmask 58368  }
  0x15   :  { %107 = vst [vmem:[#allocation1 + $0x1] ss:$4 sm:$0xff] %v84_v4  ;;  %196 = vmatpush.msra.mxu1 %v174_v8  ;;  %253 = vmatpush.msra.mxu2 %v174_v8  ;;  %s1159_s16 = sshll.u32 %s1416_s15, 4  ;;  %s1161_s0 = sshll.u32 %s1678_s7, 4  ;;  %s1160_s16 = int_to_ptr.vmem [resolvable:$true] %s1159_s16  ;;  %s1162_s0 = int_to_ptr.hbm [resolvable:$true] %s1161_s0 }
  0x16   :  { %109 = vst [vmem:[#allocation1 + $0x2] ss:$4 sm:$0xff] %v85_v5  ;;  %306 = vmatpush.msra.mxu3 %v174_v8  ;;  %518 = vmatpush.msrb.mxu0 %v174_v8 }
  0x17   :  { %111 = vst [vmem:[#allocation1 + $0x3] ss:$4 sm:$0xff] %v86_v6  ;;  %197 = vmatpush.msra.mxu1 %v173_v9  ;;  %v176_v11 = vld [vmem:[#allocation2] sm:$0x3]  ;;  %254 = vmatpush.msra.mxu2 %v173_v9 }
  0x18   :  { %307 = vmatpush.msra.mxu3 %v173_v9  ;;  %519 = vmatpush.msrb.mxu0 %v173_v9 }
  0x19   :  { %198 = vmatpush.msra.mxu1 %v172_v10  ;;  %255 = vmatpush.msra.mxu2 %v172_v10  ;;  %v177_v23 = vld [vmem:[#allocation3] sm:$0x3] }
  0x1a   :  { %1174 = vmatmul.msk.f32.vlgmr.msra.gmra.mxu1 %vm179_vm1, %v176_v11  ;;  %308 = vmatpush.msra.mxu3 %v172_v10 }
  0x1b   :  { %358 = vmatpush.msrb.mxu1 %v175_v7  ;;  %411 = vmatpush.msrb.mxu2 %v175_v7 }
  0x1c   :  { %464 = vmatpush.msrb.mxu3 %v175_v7  ;;  %520 = vmatpush.msrb.mxu0 %v172_v10 }
  0x1d   :  { %359 = vmatpush.msrb.mxu1 %v174_v8  ;;  %412 = vmatpush.msrb.mxu2 %v174_v8 }
  0x1e   :  { %v120_v12 = vld.sshfl [vmem:[#allocation1] sm:$0xff pattern:$0x73625140]  ;;  %465 = vmatpush.msrb.mxu3 %v174_v8 }
  0x1f   :  { %1172 = vmatmul.msk.f32.vlgmr.msra.gmra.mxu0 %vm122_vm2, %v120_v12  ;;  %360 = vmatpush.msrb.mxu1 %v173_v9 }
  0x20   :  { %413 = vmatpush.msrb.mxu2 %v173_v9  ;;  %466 = vmatpush.msrb.mxu3 %v173_v9 }
  0x21   :  { %361 = vmatpush.msrb.mxu1 %v172_v10 }
  0x22   :  { %414 = vmatpush.msrb.mxu2 %v172_v10  ;;  %467 = vmatpush.msrb.mxu3 %v172_v10 }
  0x23   :  { %570 = vmatpush.msra.mxu1 %v175_v7 }
  0x25   :  { %571 = vmatpush.msra.mxu1 %v174_v8 }
  0x27   :  { %572 = vmatpush.msra.mxu1 %v173_v9 }
  0x29   :  { %573 = vmatpush.msra.mxu1 %v172_v10 }
  0x97   :  { %v200_v19 = vpop.f32.mrf.mxu1 }
  0x9c   :  { %v144_v14 = vpop.f32.mrf.mxu0 }
  0x9d   :  { %v145_v15 = vadd.f32 %v1477_v13, %v144_v14 }
  0x9f   :  { %v152_v16 = vrot.slane %v145_v15, 2  ;;  %v153_v17 = vrot.slane %v145_v15, 4  ;;  %v154_v18 = vrot.slane %v145_v15, 6  ;;  %164 = vst [vmem:[#allocation5] sm:$0x3] %v145_v15 }
  0xa1   :  { %165 = vst [vmem:[#allocation5 + $0x2] sm:$0x3] %v152_v16 }
  0xa2   :  { %166 = vst [vmem:[#allocation5 + $0x4] sm:$0x3] %v153_v17 }
  0xa3   :  { %167 = vst [vmem:[#allocation5 + $0x6] sm:$0x3] %v154_v18 }
  0xa6   :  { %v178_v20 = vld [vmem:[#allocation5] sm:$0x3] }
  0xa7   :  { %v203_v21 = vadd.f32 %v200_v19, %v178_v20 }
  0xa8   :  { %v237_v39 = vld [vmem:[#allocation5 + $0x2] sm:$0x3] }
  0xa9   :  { %1208 = vtanh.f32 %v203_v21  ;;  %v204_v24 = vmul.f32 0.5, %v203_v21  ;;  %v290_v57 = vld [vmem:[#allocation5 + $0x4] sm:$0x3] }
  0xaa   :  { %v343_v11 = vld [vmem:[#allocation5 + $0x6] sm:$0x3] }
  0xab   :  { %1210 = vtanh.f32 %v204_v24 }
  0xaf   :  { %v1209_v22 = vpop.eup %1208 }
  0xb0   :  { %215 = vrot.lane.b32.xlu0 %v1209_v22, %s1414_s19 }
  0xb1   :  { %v1211_v25 = vpop.eup %1210 }
  0xb2   :  { %v206_v26 = vadd.f32 1.0, %v1211_v25 }
  0xb4   :  { %v207_v27 = vmul.f32 0.5, %v206_v26  ;;  %v87_v26 = vld [vmem:[#allocation6 + $0x8] sm:$0x3] }
  0xb5   :  { %113 = vst [vmem:[#allocation1 + $0x20] ss:$4 sm:$0xff] %v87_v26 }
  0xb8   :  { %210 = vrot.lane.b32.xlu0 %v177_v23, %s1410_s13 }
 0x122   :  { %v216_v28 = vpop.permute.xlu0 %215 }
 0x123   :  { %v218_v29 = vmul.f32 %v216_v28, %v207_v27  ;;  %v89_v28 = vld [vmem:[#allocation6 + $0xc] sm:$0x3] }
 0x124   :  { %117 = vst [vmem:[#allocation1 + $0x22] ss:$4 sm:$0xff] %v89_v28 }
 0x125   :  { %220 = vrot.lane.b32.xlu1 %v218_v29, %s1410_s13  ;;  %v90_v29 = vld [vmem:[#allocation6 + $0xe] sm:$0x3] }
 0x126   :  { %119 = vst [vmem:[#allocation1 + $0x23] ss:$4 sm:$0xff] %v90_v29 }
 0x12a   :  { %v211_v30 = vpop.permute.xlu0 %210 }
 0x12b   :  { %v213_v31 = vmul.f32 %v211_v30, %v207_v27 }
 0x197   :  { %v221_v32 = vpop.permute.xlu1 %220 }
 0x198   :  { %v223_v33 = vadd.f32 %v221_v32, %v213_v31 }
 0x19a   :  { %1212 = vtanh.f32 %v223_v33 }
 0x1a0   :  { %v1213_v34 = vpop.eup %1212 }
 0x1a1   :  { %226 = vrot.lane.b32.xlu1 %v1213_v34, %s1414_s19  ;;  %v623_v34 = vld [vmem:[%s1673_s2 + $0x10] sm:$0xff] }
 0x213   :  { %v227_v35 = vpop.permute.xlu1 %226 }
 0x214   :  { %v229_v36 = vmul.f32 %v227_v35, %v207_v27  ;;  %v88_v27 = vld [vmem:[#allocation6 + $0xa] sm:$0x3]  ;;  %v622_v35 = vld [vmem:[%s1673_s2 + $0x8] sm:$0xff] }
 0x215   :  { %115 = vst [vmem:[#allocation1 + $0x21] ss:$4 sm:$0xff] %v88_v27 }
 0x216   :  { %231 = vrot.lane.b32.xlu2 %v229_v36, %s1410_s13  ;;  %v621_v36 = vld [vmem:[%s1673_s2] sm:$0xff] }
 0x21c   :  { %v121_v30 = vld.sshfl [vmem:[#allocation1 + $0x20] sm:$0xff pattern:$0x73625140] }
 0x21d   :  { %1173 = vmatmul.msk.f32.gmra.mxu0 %vm122_vm2, %v121_v30 }
 0x270   :  { %v232_v37 = vpop.permute.xlu2 %231 }
 0x271   :  { %235 = vst.msk [vmem:[#allocation4] sm:$0x3] %vm78_vm0, %v232_v37  ;;  %1175 = vmatmul.msk.f32.vlgmr.msra.gmra.mxu2 %vm179_vm1, %v232_v37 }
 0x278   :  { %v613_v38 = vld [vmem:[#allocation4] sm:$0x3] }
 0x279   :  { %638 = vst [vmem:[#allocation1] ss:$4 sm:$0xff] %v613_v38 }
 0x29a   :  { %v147_v37 = vpop.f32.mrf.mxu0 }
 0x29b   :  { %v148_v38 = vadd.f32 %v1477_v13, %v147_v37 }
 0x29d   :  { %168 = vst [vmem:[#allocation5 + $0x8] sm:$0x3] %v148_v38 }
 0x2f4   :  { %v257_v40 = vpop.f32.mrf.mxu2 }
 0x2f5   :  { %v260_v41 = vadd.f32 %v257_v40, %v237_v39  ;;  %v155_v39 = vrot.slane %v148_v38, 2  ;;  %v156_v40 = vrot.slane %v148_v38, 4 }
 0x2f7   :  { %1214 = vtanh.f32 %v260_v41  ;;  %v261_v43 = vmul.f32 0.5, %v260_v41  ;;  %v157_v41 = vrot.slane %v148_v38, 6  ;;  %169 = vst [vmem:[#allocation5 + $0xa] sm:$0x3] %v155_v39 }
 0x2f8   :  { %170 = vst [vmem:[#allocation5 + $0xc] sm:$0x3] %v156_v40 }
 0x2f9   :  { %1216 = vtanh.f32 %v261_v43  ;;  %171 = vst [vmem:[#allocation5 + $0xe] sm:$0x3] %v157_v41 }
 0x2fd   :  { %v1215_v42 = vpop.eup %1214 }
 0x2fe   :  { %268 = vrot.lane.b32.xlu2 %v1215_v42, %s1414_s19 }
 0x2ff   :  { %v1217_v44 = vpop.eup %1216 }
 0x300   :  { %v263_v45 = vadd.f32 1.0, %v1217_v44 }
 0x302   :  { %v264_v46 = vmul.f32 0.5, %v263_v45  ;;  %v396_v45 = vld [vmem:[#allocation5 + $0x8] sm:$0x3] }
 0x304   :  { %v266_v49 = vmul.f32 %v264_v46, %v223_v33  ;;  %v624_v33 = vld [vmem:[%s1673_s2 + $0x18] sm:$0xff] }
 0x305   :  { %671 = vmatpush.msra.mxu2 %v624_v33 }
 0x307   :  { %672 = vmatpush.msra.mxu2 %v623_v34 }
 0x309   :  { %673 = vmatpush.msra.mxu2 %v622_v35 }
 0x30b   :  { %674 = vmatpush.msra.mxu2 %v621_v36 }
 0x358   :  { %v269_v47 = vpop.permute.xlu2 %268 }
 0x359   :  { %v271_v48 = vmul.f32 %v269_v47, %v264_v46 }
 0x35b   :  { %273 = vrot.lane.b32.xlu0 %v271_v48, %s1410_s13  ;;  %v1527_v48 = vld [vmem:[%s1675_s4 + $0x1] ss:$0 sm:$0xff]  ;;  %s1415_s4 = smov 96  }
 0x3cd   :  { %v274_v50 = vpop.permute.xlu0 %273 }
 0x3ce   :  { %v276_v51 = vadd.f32 %v274_v50, %v266_v49 }
 0x3d0   :  { %1218 = vtanh.f32 %v276_v51 }
 0x3d6   :  { %v1219_v52 = vpop.eup %1218 }
 0x3d7   :  { %279 = vrot.lane.b32.xlu1 %v1219_v52, %s1414_s19 }
 0x449   :  { %v280_v53 = vpop.permute.xlu1 %279 }
 0x44a   :  { %v282_v54 = vmul.f32 %v280_v53, %v264_v46 }
 0x44c   :  { %284 = vrot.lane.b32.xlu2 %v282_v54, %s1410_s13 }
 0x4a6   :  { %v285_v55 = vpop.permute.xlu2 %284 }
 0x4a7   :  { %288 = vst.msk [vmem:[#allocation4 + $0x2] sm:$0x3] %vm78_vm0, %v285_v55  ;;  %1176 = vmatmul.msk.f32.vlgmr.msra.gmra.mxu3 %vm179_vm1, %v285_v55 }
 0x4ae   :  { %v614_v56 = vld [vmem:[#allocation4 + $0x2] sm:$0x3] }
 0x4af   :  { %640 = vst [vmem:[#allocation1 + $0x1] ss:$4 sm:$0xff] %v614_v56 }
 0x52a   :  { %v310_v58 = vpop.f32.mrf.mxu3 }
 0x52b   :  { %v313_v59 = vadd.f32 %v310_v58, %v290_v57 }
 0x52d   :  { %1220 = vtanh.f32 %v313_v59  ;;  %v314_v61 = vmul.f32 0.5, %v313_v59 }
 0x52f   :  { %1222 = vtanh.f32 %v314_v61 }
 0x533   :  { %v1221_v60 = vpop.eup %1220 }
 0x534   :  { %321 = vrot.lane.b32.xlu0 %v1221_v60, %s1414_s19 }
 0x535   :  { %v1223_v62 = vpop.eup %1222 }
 0x536   :  { %v316_v63 = vadd.f32 1.0, %v1223_v62 }
 0x538   :  { %v317_v0 = vmul.f32 0.5, %v316_v63 }
 0x53a   :  { %v319_v3 = vmul.f32 %v317_v0, %v276_v51 }
 0x5a6   :  { %v322_v1 = vpop.permute.xlu0 %321 }
 0x5a7   :  { %v324_v2 = vmul.f32 %v322_v1, %v317_v0 }
 0x5a9   :  { %326 = vrot.lane.b32.xlu1 %v324_v2, %s1410_s13  ;;  %v1537_v2 = vld [vmem:[#allocation11 + $0x38] sm:$0xff] }
 0x5aa   :  { %729 = vmatpush.msra.mxu3 %v1537_v2  ;;  %782 = vmatpush.msra.mxu0 %v1537_v2 }
 0x61b   :  { %v327_v4 = vpop.permute.xlu1 %326 }
 0x61c   :  { %v329_v5 = vadd.f32 %v327_v4, %v319_v3  ;;  %v1541_v3 = vld [vmem:[#allocation11 + $0x30] sm:$0xff]  ;;  %v1547_v4 = vld [vmem:[#allocation11 + $0x28] sm:$0xff] }
 0x61d   :  { %730 = vmatpush.msra.mxu3 %v1541_v3  ;;  %783 = vmatpush.msra.mxu0 %v1541_v3 }
 0x61e   :  { %1224 = vtanh.f32 %v329_v5 }
 0x61f   :  { %731 = vmatpush.msra.mxu3 %v1547_v4  ;;  %784 = vmatpush.msra.mxu0 %v1547_v4 }
 0x624   :  { %v1225_v6 = vpop.eup %1224 }
 0x625   :  { %332 = vrot.lane.b32.xlu2 %v1225_v6, %s1414_s19 }
 0x67f   :  { %v333_v7 = vpop.permute.xlu2 %332 }
 0x680   :  { %v335_v8 = vmul.f32 %v333_v7, %v317_v0  ;;  %v710_v7 = vld [vmem:[#allocation2 + $0x2] sm:$0x3] }
 0x682   :  { %337 = vrot.lane.b32.xlu0 %v335_v8, %s1410_s13 }
 0x6f4   :  { %v338_v9 = vpop.permute.xlu0 %337 }
 0x6f5   :  { %341 = vst.msk [vmem:[#allocation4 + $0x4] sm:$0x3] %vm78_vm0, %v338_v9  ;;  %1177 = vmatmul.msk.f32.vlgmr.msrb.gmra.mxu1 %vm179_vm1, %v338_v9  ;;  %v449_v9 = vld [vmem:[#allocation5 + $0xa] sm:$0x3] }
 0x6f6   :  { %831 = vmatpush.msrb.mxu1 %v1537_v2 }
 0x6f8   :  { %832 = vmatpush.msrb.mxu1 %v1541_v3 }
 0x6fa   :  { %833 = vmatpush.msrb.mxu1 %v1547_v4 }
 0x6fc   :  { %v615_v10 = vld [vmem:[#allocation4 + $0x4] sm:$0x3] }
 0x6fd   :  { %642 = vst [vmem:[#allocation1 + $0x2] ss:$4 sm:$0xff] %v615_v10 }
 0x772   :  { %v363_v12 = vpop.f32.mrf.mxu1 }
 0x773   :  { %v366_v14 = vadd.f32 %v363_v12, %v343_v11 }
 0x775   :  { %1226 = vtanh.f32 %v366_v14  ;;  %v367_v16 = vmul.f32 0.5, %v366_v14 }
 0x777   :  { %1228 = vtanh.f32 %v367_v16 }
 0x77b   :  { %v1227_v15 = vpop.eup %1226 }
 0x77c   :  { %374 = vrot.lane.b32.xlu1 %v1227_v15, %s1414_s19 }
 0x77d   :  { %v1229_v17 = vpop.eup %1228 }
 0x77e   :  { %v369_v18 = vadd.f32 1.0, %v1229_v17  ;;  %v712_v17 = vld [vmem:[#allocation3 + $0x2] sm:$0x3] }
 0x780   :  { %v370_v19 = vmul.f32 0.5, %v369_v18 }
 0x782   :  { %v372_v22 = vmul.f32 %v370_v19, %v329_v5  ;;  %v1553_v5 = vld [vmem:[#allocation11 + $0x20] sm:$0xff] }
 0x783   :  { %732 = vmatpush.msra.mxu3 %v1553_v5  ;;  %785 = vmatpush.msra.mxu0 %v1553_v5 }
 0x784   :  { %834 = vmatpush.msrb.mxu1 %v1553_v5 }
 0x7ee   :  { %v375_v20 = vpop.permute.xlu1 %374 }
 0x7ef   :  { %v377_v21 = vmul.f32 %v375_v20, %v370_v19 }
 0x7f1   :  { %379 = vrot.lane.b32.xlu2 %v377_v21, %s1410_s13 }
 0x84b   :  { %v380_v23 = vpop.permute.xlu2 %379 }
 0x84c   :  { %v1501_v24 = vadd.f32 %v380_v23, %v372_v22 }
 0x84e   :  { %1230 = vtanh.f32 %v1501_v24 }
 0x854   :  { %v1231_v25 = vpop.eup %1230 }
 0x855   :  { %385 = vrot.lane.b32.xlu0 %v1231_v25, %s1414_s19 }
 0x8c7   :  { %v386_v31 = vpop.permute.xlu0 %385 }
 0x8c8   :  { %v388_v32 = vmul.f32 %v386_v31, %v370_v19 }
 0x8ca   :  { %390 = vrot.lane.b32.xlu1 %v388_v32, %s1410_s13 }
 0x93c   :  { %v391_v42 = vpop.permute.xlu1 %390 }
 0x93d   :  { %394 = vst.msk [vmem:[#allocation4 + $0x6] sm:$0x3] %vm78_vm0, %v391_v42  ;;  %1178 = vmatmul.msk.f32.vlgmr.msrb.gmra.mxu2 %vm179_vm1, %v391_v42 }
 0x93e   :  { %1027 = vmatpush.msrb.mxu2 %v1537_v2 }
 0x940   :  { %1028 = vmatpush.msrb.mxu2 %v1541_v3 }
 0x942   :  { %1029 = vmatpush.msrb.mxu2 %v1547_v4 }
 0x944   :  { %v616_v43 = vld [vmem:[#allocation4 + $0x6] sm:$0x3]  ;;  %1030 = vmatpush.msrb.mxu2 %v1553_v5 }
 0x945   :  { %644 = vst [vmem:[#allocation1 + $0x3] ss:$4 sm:$0xff] %v616_v43 }
 0x94c   :  { %v653_v44 = vld.sshfl [vmem:[#allocation1] sm:$0xff pattern:$0x73625140] }
 0x94d   :  { %1183 = vmatmul.msk.f32.vlgmr.msra.gmra.mxu2 %vm179_vm1, %v653_v44 }
 0x9c0   :  { %v416_v46 = vpop.f32.mrf.mxu2 }
 0x9c1   :  { %v419_v13 = vadd.f32 %v416_v46, %v396_v45 }
 0x9c3   :  { %1232 = vtanh.f32 %v419_v13  ;;  %v420_v54 = vmul.f32 0.5, %v419_v13  ;;  %v502_v13 = vld [vmem:[#allocation5 + $0xc] sm:$0x3] }
 0x9c5   :  { %1234 = vtanh.f32 %v420_v54 }
 0x9c9   :  { %v1233_v47 = vpop.eup %1232 }
 0x9ca   :  { %427 = vrot.lane.b32.xlu2 %v1233_v47, %s1414_s19 }
 0x9cb   :  { %v1235_v55 = vpop.eup %1234 }
 0x9cc   :  { %v422_v56 = vadd.f32 1.0, %v1235_v55 }
 0x9ce   :  { %v423_v57 = vmul.f32 0.5, %v422_v56 }
 0x9d0   :  { %v676_v49 = vpop.f32.mrf.mxu2  ;;  %v425_v60 = vmul.f32 %v423_v57, %v1501_v24 }
 0x9d1   :  { %v677_v50 = vadd.f32 %v1527_v48, %v676_v49 }
 0x9d3   :  { %v684_v51 = vrot.slane %v677_v50, 2  ;;  %v685_v52 = vrot.slane %v677_v50, 4  ;;  %v686_v53 = vrot.slane %v677_v50, 6  ;;  %696 = vst [vmem:[#allocation5] sm:$0x3] %v677_v50 }
 0x9d5   :  { %697 = vst [vmem:[#allocation5 + $0x2] sm:$0x3] %v684_v51 }
 0x9d6   :  { %698 = vst [vmem:[#allocation5 + $0x4] sm:$0x3] %v685_v52 }
 0x9d7   :  { %699 = vst [vmem:[#allocation5 + $0x6] sm:$0x3] %v686_v53 }
 0x9da   :  { %v713_v12 = vld [vmem:[#allocation5] sm:$0x3] }
 0x9dc   :  { %v764_v51 = vld [vmem:[#allocation5 + $0x2] sm:$0x3] }
 0xa24   :  { %v428_v58 = vpop.permute.xlu2 %427 }
 0xa25   :  { %v430_v59 = vmul.f32 %v428_v58, %v423_v57 }
 0xa27   :  { %432 = vrot.lane.b32.xlu0 %v430_v59, %s1410_s13 }
 0xa99   :  { %v433_v61 = vpop.permute.xlu0 %432 }
 0xa9a   :  { %v1532_v62 = vadd.f32 %v433_v61, %v425_v60 }
 0xa9c   :  { %1236 = vtanh.f32 %v1532_v62 }
 0xaa2   :  { %v1237_v63 = vpop.eup %1236 }
 0xaa3   :  { %438 = vrot.lane.b32.xlu1 %v1237_v63, %s1414_s19 }
 0xb15   :  { %v439_v0 = vpop.permute.xlu1 %438 }
 0xb16   :  { %v441_v1 = vmul.f32 %v439_v0, %v423_v57 }
 0xb18   :  { %443 = vrot.lane.b32.xlu2 %v441_v1, %s1410_s13 }
 0xb72   :  { %v444_v6 = vpop.permute.xlu2 %443 }
 0xb73   :  { %447 = vst.msk [vmem:[#allocation4 + $0x8] sm:$0x3] %vm78_vm0, %v444_v6  ;;  %1179 = vmatmul.msk.f32.vlgmr.msrb.gmra.mxu3 %vm179_vm1, %v444_v6 }
 0xb74   :  { %880 = vmatpush.msrb.mxu3 %v1537_v2 }
 0xb76   :  { %881 = vmatpush.msrb.mxu3 %v1541_v3 }
 0xb78   :  { %882 = vmatpush.msrb.mxu3 %v1547_v4 }
 0xb7a   :  { %v617_v8 = vld [vmem:[#allocation4 + $0x8] sm:$0x3]  ;;  %883 = vmatpush.msrb.mxu3 %v1553_v5 }
 0xb7b   :  { %646 = vst [vmem:[#allocation1 + $0x20] ss:$4 sm:$0xff] %v617_v8  ;;  %1185 = vmatmul.msk.f32.vlgmr.msra.gmra.mxu3 %vm179_vm1, %v710_v7 }
 0xb7c   :  { %1076 = vmatpush.msra.mxu3 %v1537_v2 }
 0xb7e   :  { %1077 = vmatpush.msra.mxu3 %v1541_v3 }
 0xb80   :  { %1078 = vmatpush.msra.mxu3 %v1547_v4 }
 0xb82   :  { %1079 = vmatpush.msra.mxu3 %v1553_v5 }
 0xbf6   :  { %v469_v10 = vpop.f32.mrf.mxu3 }
 0xbf7   :  { %v472_v11 = vadd.f32 %v469_v10, %v449_v9 }
 0xbf9   :  { %1238 = vtanh.f32 %v472_v11  ;;  %v473_v19 = vmul.f32 0.5, %v472_v11 }
 0xbfe   :  { %v734_v14 = vpop.f32.mrf.mxu3 }
 0xbff   :  { %v1239_v15 = vpop.eup %1238  ;;  %v737_v16 = vadd.f32 %v734_v14, %v713_v12 }
 0xc00   :  { %480 = vrot.lane.b32.xlu0 %v1239_v15, %s1414_s19 }
 0xc01   :  { %1240 = vtanh.f32 %v737_v16  ;;  %v738_v20 = vmul.f32 0.5, %v737_v16 }
 0xc02   :  { %1242 = vtanh.f32 %v473_v19 }
 0xc03   :  { %1244 = vtanh.f32 %v738_v20 }
 0xc07   :  { %v1241_v18 = vpop.eup %1240 }
 0xc08   :  { %744 = vrot.lane.b32.xlu0 %v712_v17, %s1410_s13  ;;  %749 = vrot.lane.b32.xlu1 %v1241_v18, %s1414_s19  ;;  %v1243_v21 = vpop.eup %1242 }
 0xc09   :  { %v475_v22 = vadd.f32 1.0, %v1243_v21  ;;  %v1245_v24 = vpop.eup %1244 }
 0xc0a   :  { %v740_v27 = vadd.f32 1.0, %v1245_v24  ;;  %v813_v24 = vld [vmem:[#allocation5 + $0x4] sm:$0x3] }
 0xc0b   :  { %v476_v23 = vmul.f32 0.5, %v475_v22 }
 0xc0c   :  { %v741_v28 = vmul.f32 0.5, %v740_v27 }
 0xc0d   :  { %v478_v31 = vmul.f32 %v476_v23, %v1532_v62 }
 0xc72   :  { %v481_v25 = vpop.permute.xlu0 %480 }
 0xc73   :  { %v483_v26 = vmul.f32 %v481_v25, %v476_v23 }
 0xc75   :  { %485 = vrot.lane.b32.xlu2 %v483_v26, %s1410_s13 }
 0xc7a   :  { %v750_v29 = vpop.permute.xlu1 %749  ;;  %v745_v35 = vpop.permute.xlu0 %744 }
 0xc7b   :  { %v752_v30 = vmul.f32 %v750_v29, %v741_v28  ;;  %v747_v36 = vmul.f32 %v745_v35, %v741_v28 }
 0xc7d   :  { %754 = vrot.lane.b32.xlu1 %v752_v30, %s1410_s13 }
 0xccf   :  { %v486_v32 = vpop.permute.xlu2 %485 }
 0xcd0   :  { %v488_v33 = vadd.f32 %v486_v32, %v478_v31 }
 0xcd2   :  { %1246 = vtanh.f32 %v488_v33 }
 0xcd8   :  { %v1247_v34 = vpop.eup %1246 }
 0xcd9   :  { %491 = vrot.lane.b32.xlu2 %v1247_v34, %s1414_s19 }
 0xcef   :  { %v755_v37 = vpop.permute.xlu1 %754 }
 0xcf0   :  { %v757_v38 = vadd.f32 %v755_v37, %v747_v36 }
 0xcf2   :  { %1248 = vtanh.f32 %v757_v38 }
 0xcf8   :  { %v1249_v39 = vpop.eup %1248 }
 0xcf9   :  { %760 = vrot.lane.b32.xlu0 %v1249_v39, %s1414_s19 }
 0xd33   :  { %v492_v40 = vpop.permute.xlu2 %491 }
 0xd34   :  { %v494_v41 = vmul.f32 %v492_v40, %v476_v23 }
 0xd36   :  { %496 = vrot.lane.b32.xlu1 %v494_v41, %s1410_s13 }
 0xd6b   :  { %v761_v42 = vpop.permute.xlu0 %760 }
 0xd6c   :  { %v763_v43 = vmul.f32 %v761_v42, %v741_v28 }
 0xd6e   :  { %766 = vrot.lane.b32.xlu2 %v763_v43, %s1410_s13 }
 0xda8   :  { %v497_v44 = vpop.permute.xlu1 %496 }
 0xda9   :  { %500 = vst.msk [vmem:[#allocation4 + $0xa] sm:$0x3] %vm78_vm0, %v497_v44  ;;  %1180 = vmatmul.msk.f32.vlgmr.msrb.gmra.mxu0 %vm179_vm1, %v497_v44 }
 0xdaa   :  { %929 = vmatpush.msrb.mxu0 %v1537_v2 }
 0xdac   :  { %930 = vmatpush.msrb.mxu0 %v1541_v3 }
 0xdae   :  { %931 = vmatpush.msrb.mxu0 %v1547_v4 }
 0xdb0   :  { %v618_v45 = vld [vmem:[#allocation4 + $0xa] sm:$0x3]  ;;  %932 = vmatpush.msrb.mxu0 %v1553_v5 }
 0xdb1   :  { %648 = vst [vmem:[#allocation1 + $0x21] ss:$4 sm:$0xff] %v618_v45 }
 0xdc8   :  { %v767_v46 = vpop.permute.xlu2 %766 }
 0xdc9   :  { %1186 = vmatmul.msk.f32.vlgmr.msra.gmra.mxu0 %vm179_vm1, %v767_v46  ;;  %v862_v46 = vld [vmem:[#allocation5 + $0x6] sm:$0x3] }
 0xe26   :  { %v522_v47 = vpop.f32.mrf.mxu0 }
 0xe27   :  { %v525_v49 = vadd.f32 %v522_v47, %v502_v13 }
 0xe29   :  { %1250 = vtanh.f32 %v525_v49  ;;  %v526_v55 = vmul.f32 0.5, %v525_v49 }
 0xe2f   :  { %v1251_v50 = vpop.eup %1250 }
 0xe30   :  { %533 = vrot.lane.b32.xlu0 %v1251_v50, %s1414_s19 }
 0xe46   :  { %v787_v52 = vpop.f32.mrf.mxu0 }
 0xe47   :  { %v790_v53 = vadd.f32 %v787_v52, %v764_v51 }
 0xe49   :  { %1252 = vtanh.f32 %v790_v53  ;;  %v791_v61 = vmul.f32 0.5, %v790_v53 }
 0xe4a   :  { %1254 = vtanh.f32 %v526_v55 }
 0xe4b   :  { %1256 = vtanh.f32 %v791_v61 }
 0xe4f   :  { %v1253_v54 = vpop.eup %1252 }
 0xe50   :  { %798 = vrot.lane.b32.xlu1 %v1253_v54, %s1414_s19  ;;  %v1255_v56 = vpop.eup %1254 }
 0xe51   :  { %v528_v57 = vadd.f32 1.0, %v1255_v56  ;;  %v1257_v62 = vpop.eup %1256 }
 0xe52   :  { %v793_v63 = vadd.f32 1.0, %v1257_v62 }
 0xe53   :  { %v529_v58 = vmul.f32 0.5, %v528_v57 }
 0xe54   :  { %v794_v0 = vmul.f32 0.5, %v793_v63 }
 0xe55   :  { %v531_v7 = vmul.f32 %v529_v58, %v488_v33 }
 0xe56   :  { %v796_v11 = vmul.f32 %v794_v0, %v757_v38 }
 0xea2   :  { %v534_v59 = vpop.permute.xlu0 %533 }
 0xea3   :  { %v536_v60 = vmul.f32 %v534_v59, %v529_v58 }
 0xea5   :  { %538 = vrot.lane.b32.xlu2 %v536_v60, %s1410_s13 }
 0xec2   :  { %v799_v1 = vpop.permute.xlu1 %798 }
 0xec3   :  { %v801_v6 = vmul.f32 %v799_v1, %v794_v0 }
 0xec5   :  { %803 = vrot.lane.b32.xlu0 %v801_v6, %s1410_s13 }
 0xeff   :  { %v539_v8 = vpop.permute.xlu2 %538 }
 0xf00   :  { %v1593_v9 = vadd.f32 %v539_v8, %v531_v7 }
 0xf02   :  { %1258 = vtanh.f32 %v1593_v9 }
 0xf08   :  { %v1259_v10 = vpop.eup %1258 }
 0xf09   :  { %544 = vrot.lane.b32.xlu1 %v1259_v10, %s1414_s19 }
 0xf37   :  { %v804_v12 = vpop.permute.xlu0 %803 }
 0xf38   :  { %v806_v14 = vadd.f32 %v804_v12, %v796_v11 }
 0xf3a   :  { %1260 = vtanh.f32 %v806_v14 }
 0xf40   :  { %v1261_v15 = vpop.eup %1260 }
 0xf41   :  { %809 = vrot.lane.b32.xlu2 %v1261_v15, %s1414_s19 }
 0xf7b   :  { %v545_v16 = vpop.permute.xlu1 %544 }
 0xf7c   :  { %v547_v17 = vmul.f32 %v545_v16, %v529_v58 }
 0xf7e   :  { %549 = vrot.lane.b32.xlu0 %v547_v17, %s1410_s13 }
 0xf9b   :  { %v810_v18 = vpop.permute.xlu2 %809 }
 0xf9c   :  { %v812_v19 = vmul.f32 %v810_v18, %v794_v0 }
 0xf9e   :  { %815 = vrot.lane.b32.xlu1 %v812_v19, %s1410_s13 }
 0xff0   :  { %v550_v20 = vpop.permute.xlu0 %549 }
 0xff1   :  { %553 = vst.msk [vmem:[#allocation4 + $0xc] sm:$0x3] %vm78_vm0, %v550_v20  ;;  %1181 = vmatmul.msk.f32.vlgmr.msra.gmra.mxu1 %vm179_vm1, %v550_v20 }
 0xff2   :  { %978 = vmatpush.msra.mxu1 %v1537_v2 }
 0xff4   :  { %979 = vmatpush.msra.mxu1 %v1541_v3 }
 0xff6   :  { %980 = vmatpush.msra.mxu1 %v1547_v4  ;;  %v555_v4 = vld [vmem:[#allocation5 + $0xe] sm:$0x3] }
 0xff8   :  { %v619_v21 = vld [vmem:[#allocation4 + $0xc] sm:$0x3]  ;;  %981 = vmatpush.msra.mxu1 %v1553_v5 }
 0xff9   :  { %650 = vst [vmem:[#allocation1 + $0x22] ss:$4 sm:$0xff] %v619_v21 }
0x1010   :  { %v816_v22 = vpop.permute.xlu1 %815 }
0x1011   :  { %1187 = vmatmul.msk.f32.vlgmr.msrb.gmra.mxu1 %vm179_vm1, %v816_v22 }
0x106e   :  { %v575_v23 = vpop.f32.mrf.mxu1 }
0x106f   :  { %v578_v30 = vadd.f32 %v575_v23, %v555_v4 }
0x1071   :  { %v579_v37 = vmul.f32 0.5, %v578_v30 }
0x108e   :  { %v836_v25 = vpop.f32.mrf.mxu1 }
0x108f   :  { %v839_v26 = vadd.f32 %v836_v25, %v813_v24 }
0x1091   :  { %1262 = vtanh.f32 %v839_v26  ;;  %v840_v2 = vmul.f32 0.5, %v839_v26 }
0x1093   :  { %1264 = vtanh.f32 %v840_v2 }
0x1094   :  { %1266 = vtanh.f32 %v578_v30 }
0x1097   :  { %v1263_v27 = vpop.eup %1262 }
0x1098   :  { %847 = vrot.lane.b32.xlu2 %v1263_v27, %s1414_s19 }
0x1099   :  { %v1265_v3 = vpop.eup %1264 }
0x109a   :  { %v842_v28 = vadd.f32 1.0, %v1265_v3  ;;  %v1267_v32 = vpop.eup %1266 }
0x109c   :  { %v843_v29 = vmul.f32 0.5, %v842_v28 }
0x109e   :  { %v845_v33 = vmul.f32 %v843_v29, %v806_v14 }
0x10f2   :  { %v848_v5 = vpop.permute.xlu2 %847 }
0x10f3   :  { %v850_v31 = vmul.f32 %v848_v5, %v843_v29 }
0x10f5   :  { %852 = vrot.lane.b32.xlu0 %v850_v31, %s1410_s13 }
0x10fd   :  { %586 = vrot.lane.b32.xlu0 %v1267_v32, %s1414_s19 }
0x1167   :  { %v853_v34 = vpop.permute.xlu0 %852 }
0x1168   :  { %v855_v35 = vadd.f32 %v853_v34, %v845_v33 }
0x116a   :  { %1268 = vtanh.f32 %v855_v35 }
0x116b   :  { %1270 = vtanh.f32 %v579_v37 }
0x116f   :  { %v587_v42 = vpop.permute.xlu0 %586 }
0x1170   :  { %v1269_v36 = vpop.eup %1268 }
0x1171   :  { %858 = vrot.lane.b32.xlu1 %v1269_v36, %s1414_s19  ;;  %v1271_v38 = vpop.eup %1270 }
0x1172   :  { %v581_v41 = vadd.f32 1.0, %v1271_v38 }
0x1174   :  { %v582_v43 = vmul.f32 0.5, %v581_v41 }
0x1176   :  { %v589_v44 = vmul.f32 %v587_v42, %v582_v43  ;;  %v584_v50 = vmul.f32 %v582_v43, %v1593_v9 }
0x11e3   :  { %v859_v39 = vpop.permute.xlu1 %858 }
0x11e4   :  { %v861_v40 = vmul.f32 %v859_v39, %v843_v29 }
0x11e6   :  { %864 = vrot.lane.b32.xlu2 %v861_v40, %s1410_s13 }
0x11ee   :  { %591 = vrot.lane.b32.xlu2 %v589_v44, %s1410_s13 }
0x1240   :  { %v865_v45 = vpop.permute.xlu2 %864 }
0x1241   :  { %1188 = vmatmul.msk.f32.vlgmr.msrb.gmra.mxu3 %vm179_vm1, %v865_v45 }
0x1248   :  { %v592_v49 = vpop.permute.xlu2 %591 }
0x1249   :  { %v1615_v51 = vadd.f32 %v592_v49, %v584_v50 }
0x12c4   :  { %v885_v13 = vpop.f32.mrf.mxu3 }
0x12c5   :  { %v888_v47 = vadd.f32 %v885_v13, %v862_v46 }
0x12c7   :  { %1272 = vtanh.f32 %v888_v47  ;;  %v889_v54 = vmul.f32 0.5, %v888_v47 }
0x12c8   :  { %1274 = vtanh.f32 %v1615_v51 }
0x12c9   :  { %1276 = vtanh.f32 %v889_v54 }
0x12cd   :  { %v1273_v52 = vpop.eup %1272 }
0x12ce   :  { %896 = vrot.lane.b32.xlu1 %v1273_v52, %s1414_s19  ;;  %v1275_v53 = vpop.eup %1274 }
0x12cf   :  { %v1277_v55 = vpop.eup %1276 }
0x12d0   :  { %v891_v56 = vadd.f32 1.0, %v1277_v55 }
0x12d2   :  { %v892_v57 = vmul.f32 0.5, %v891_v56 }
0x12d4   :  { %v894_v62 = vmul.f32 %v892_v57, %v855_v35 }
0x12d6   :  { %597 = vrot.lane.b32.xlu1 %v1275_v53, %s1414_s19 }
0x1340   :  { %v897_v58 = vpop.permute.xlu1 %896 }
0x1341   :  { %v899_v59 = vmul.f32 %v897_v58, %v892_v57 }
0x1343   :  { %901 = vrot.lane.b32.xlu0 %v899_v59, %s1410_s13 }
0x1348   :  { %v598_v60 = vpop.permute.xlu1 %597 }
0x1349   :  { %v600_v61 = vmul.f32 %v598_v60, %v582_v43 }
0x134b   :  { %602 = vrot.lane.b32.xlu0 %v600_v61, %s1410_s13 }
0x13b5   :  { %v902_v63 = vpop.permute.xlu0 %901 }
0x13b6   :  { %v904_v0 = vadd.f32 %v902_v63, %v894_v62 }
0x13b8   :  { %1278 = vtanh.f32 %v904_v0 }
0x13bd   :  { %v603_v1 = vpop.permute.xlu0 %602 }
0x13be   :  { %v1279_v6 = vpop.eup %1278  ;;  %606 = vst.msk [vmem:[#allocation4 + $0xe] sm:$0x3] %vm78_vm0, %v603_v1 }
0x13bf   :  { %607 = vst.msk [vmem:[#allocation2] sm:$0x3] %vm78_vm0, %v603_v1  ;;  %907 = vrot.lane.b32.xlu2 %v1279_v6, %s1414_s19 }
0x13c5   :  { %v620_v7 = vld [vmem:[#allocation4 + $0xe] sm:$0x3] }
0x13c6   :  { %652 = vst [vmem:[#allocation1 + $0x23] ss:$4 sm:$0xff] %v620_v7 }
0x13cd   :  { %v654_v8 = vld.sshfl [vmem:[#allocation1 + $0x20] sm:$0xff pattern:$0x73625140] }
0x13ce   :  { %1184 = vmatmul.msk.f32.gmra.mxu2 %vm179_vm1, %v654_v8 }
0x1419   :  { %v908_v9 = vpop.permute.xlu2 %907 }
0x141a   :  { %v910_v10 = vmul.f32 %v908_v9, %v892_v57 }
0x141c   :  { %913 = vrot.lane.b32.xlu1 %v910_v10, %s1410_s13 }
0x1451   :  { %v679_v11 = vpop.f32.mrf.mxu2 }
0x1452   :  { %v680_v12 = vadd.f32 %v1527_v48, %v679_v11 }
0x1454   :  { %v687_v14 = vrot.slane %v680_v12, 2  ;;  %v688_v15 = vrot.slane %v680_v12, 4  ;;  %v689_v16 = vrot.slane %v680_v12, 6  ;;  %700 = vst [vmem:[#allocation5 + $0x8] sm:$0x3] %v680_v12 }
0x1456   :  { %701 = vst [vmem:[#allocation5 + $0xa] sm:$0x3] %v687_v14 }
0x1457   :  { %702 = vst [vmem:[#allocation5 + $0xc] sm:$0x3] %v688_v15 }
0x1458   :  { %703 = vst [vmem:[#allocation5 + $0xe] sm:$0x3] %v689_v16 }
0x145b   :  { %v911_v18 = vld [vmem:[#allocation5 + $0x8] sm:$0x3] }
0x145d   :  { %v960_v5 = vld [vmem:[#allocation5 + $0xa] sm:$0x3] }
0x145e   :  { %v1009_v13 = vld [vmem:[#allocation5 + $0xc] sm:$0x3] }
0x145f   :  { %v1058_v1 = vld [vmem:[#allocation5 + $0xe] sm:$0x3] }
0x148e   :  { %v914_v17 = vpop.permute.xlu1 %913 }
0x148f   :  { %1189 = vmatmul.msk.f32.vlgmr.msrb.gmra.mxu0 %vm179_vm1, %v914_v17 }
0x150c   :  { %v934_v19 = vpop.f32.mrf.mxu0 }
0x150d   :  { %v937_v20 = vadd.f32 %v934_v19, %v911_v18 }
0x150f   :  { %1280 = vtanh.f32 %v937_v20  ;;  %v938_v22 = vmul.f32 0.5, %v937_v20 }
0x1511   :  { %1282 = vtanh.f32 %v938_v22 }
0x1515   :  { %v1281_v21 = vpop.eup %1280 }
0x1516   :  { %945 = vrot.lane.b32.xlu2 %v1281_v21, %s1414_s19 }
0x1517   :  { %v1283_v48 = vpop.eup %1282 }
0x1518   :  { %v940_v23 = vadd.f32 1.0, %v1283_v48 }
0x151a   :  { %v941_v24 = vmul.f32 0.5, %v940_v23  ;;  %v1123_v23 = vld [vmem:[%s1676_s5 + $0x10] sm:$0xff] }
0x151c   :  { %v943_v27 = vmul.f32 %v941_v24, %v904_v0 }
0x1570   :  { %v946_v25 = vpop.permute.xlu2 %945 }
0x1571   :  { %v948_v26 = vmul.f32 %v946_v25, %v941_v24  ;;  %v1121_v25 = vld [vmem:[%s1676_s5] sm:$0xff] }
0x1573   :  { %950 = vrot.lane.b32.xlu0 %v948_v26, %s1410_s13 }
0x15e5   :  { %v951_v2 = vpop.permute.xlu0 %950 }
0x15e6   :  { %v953_v3 = vadd.f32 %v951_v2, %v943_v27  ;;  %v1207_v2 = vld [vmem:[%s1677_s6] ss:$0 sm:$0xff] }
0x15e8   :  { %1284 = vtanh.f32 %v953_v3 }
0x15ee   :  { %v1285_v28 = vpop.eup %1284 }
0x15ef   :  { %956 = vrot.lane.b32.xlu1 %v1285_v28, %s1414_s19 }
0x1661   :  { %v957_v4 = vpop.permute.xlu1 %956 }
0x1662   :  { %v959_v29 = vmul.f32 %v957_v4, %v941_v24  ;;  %v1122_v24 = vld [vmem:[%s1676_s5 + $0x8] sm:$0xff] }
0x1664   :  { %962 = vrot.lane.b32.xlu2 %v959_v29, %s1410_s13 }
0x16be   :  { %v963_v30 = vpop.permute.xlu2 %962 }
0x16bf   :  { %1190 = vmatmul.msk.f32.vlgmr.msra.gmra.mxu1 %vm179_vm1, %v963_v30 }
0x173c   :  { %v983_v31 = vpop.f32.mrf.mxu1 }
0x173d   :  { %v986_v32 = vadd.f32 %v983_v31, %v960_v5 }
0x173f   :  { %1286 = vtanh.f32 %v986_v32  ;;  %v987_v34 = vmul.f32 0.5, %v986_v32 }
0x1741   :  { %1288 = vtanh.f32 %v987_v34 }
0x1745   :  { %v1287_v33 = vpop.eup %1286 }
0x1746   :  { %994 = vrot.lane.b32.xlu0 %v1287_v33, %s1414_s19 }
0x1747   :  { %v1289_v35 = vpop.eup %1288 }
0x1748   :  { %v989_v36 = vadd.f32 1.0, %v1289_v35 }
0x174a   :  { %v990_v37 = vmul.f32 0.5, %v989_v36 }
0x174c   :  { %v992_v40 = vmul.f32 %v990_v37, %v953_v3 }
0x17b8   :  { %v995_v38 = vpop.permute.xlu0 %994 }
0x17b9   :  { %v997_v39 = vmul.f32 %v995_v38, %v990_v37 }
0x17bb   :  { %999 = vrot.lane.b32.xlu1 %v997_v39, %s1410_s13 }
0x182d   :  { %v1000_v41 = vpop.permute.xlu1 %999 }
0x182e   :  { %v1002_v42 = vadd.f32 %v1000_v41, %v992_v40 }
0x1830   :  { %1290 = vtanh.f32 %v1002_v42 }
0x1836   :  { %v1291_v43 = vpop.eup %1290 }
0x1837   :  { %1005 = vrot.lane.b32.xlu2 %v1291_v43, %s1414_s19 }
0x1891   :  { %v1006_v44 = vpop.permute.xlu2 %1005 }
0x1892   :  { %v1008_v45 = vmul.f32 %v1006_v44, %v990_v37 }
0x1894   :  { %1011 = vrot.lane.b32.xlu0 %v1008_v45, %s1410_s13 }
0x1906   :  { %v1012_v46 = vpop.permute.xlu0 %1011 }
0x1907   :  { %1191 = vmatmul.msk.f32.vlgmr.msrb.gmra.mxu2 %vm179_vm1, %v1012_v46 }
0x198a   :  { %v1032_v47 = vpop.f32.mrf.mxu2 }
0x198b   :  { %v1035_v49 = vadd.f32 %v1032_v47, %v1009_v13 }
0x198d   :  { %1292 = vtanh.f32 %v1035_v49  ;;  %v1036_v52 = vmul.f32 0.5, %v1035_v49 }
0x198f   :  { %1294 = vtanh.f32 %v1036_v52 }
0x1993   :  { %v1293_v50 = vpop.eup %1292 }
0x1994   :  { %1043 = vrot.lane.b32.xlu1 %v1293_v50, %s1414_s19 }
0x1995   :  { %v1295_v53 = vpop.eup %1294 }
0x1996   :  { %v1038_v54 = vadd.f32 1.0, %v1295_v53 }
0x1998   :  { %v1039_v55 = vmul.f32 0.5, %v1038_v54 }
0x199a   :  { %v1041_v58 = vmul.f32 %v1039_v55, %v1002_v42 }
0x1a06   :  { %v1044_v56 = vpop.permute.xlu1 %1043 }
0x1a07   :  { %v1046_v57 = vmul.f32 %v1044_v56, %v1039_v55 }
0x1a09   :  { %1048 = vrot.lane.b32.xlu2 %v1046_v57, %s1410_s13 }
0x1a63   :  { %v1049_v59 = vpop.permute.xlu2 %1048 }
0x1a64   :  { %v1051_v60 = vadd.f32 %v1049_v59, %v1041_v58 }
0x1a66   :  { %1296 = vtanh.f32 %v1051_v60 }
0x1a6c   :  { %v1297_v61 = vpop.eup %1296 }
0x1a6d   :  { %1054 = vrot.lane.b32.xlu0 %v1297_v61, %s1414_s19 }
0x1adf   :  { %v1055_v62 = vpop.permute.xlu0 %1054 }
0x1ae0   :  { %v1057_v63 = vmul.f32 %v1055_v62, %v1039_v55 }
0x1ae2   :  { %1060 = vrot.lane.b32.xlu1 %v1057_v63, %s1410_s13 }
0x1b54   :  { %v1061_v0 = vpop.permute.xlu1 %1060 }
0x1b55   :  { %1192 = vmatmul.msk.f32.vlgmr.msra.gmra.mxu3 %vm179_vm1, %v1061_v0 }
0x1bd8   :  { %v1081_v6 = vpop.f32.mrf.mxu3 }
0x1bd9   :  { %v1084_v7 = vadd.f32 %v1081_v6, %v1058_v1 }
0x1bdb   :  { %1298 = vtanh.f32 %v1084_v7  ;;  %v1085_v9 = vmul.f32 0.5, %v1084_v7 }
0x1bdd   :  { %1300 = vtanh.f32 %v1085_v9 }
0x1be1   :  { %v1299_v8 = vpop.eup %1298 }
0x1be2   :  { %1092 = vrot.lane.b32.xlu2 %v1299_v8, %s1414_s19 }
0x1be3   :  { %v1301_v10 = vpop.eup %1300 }
0x1be4   :  { %v1087_v11 = vadd.f32 1.0, %v1301_v10 }
0x1be6   :  { %v1088_v12 = vmul.f32 0.5, %v1087_v11 }
0x1be8   :  { %v1090_v16 = vmul.f32 %v1088_v12, %v1051_v60 }
0x1c3c   :  { %v1093_v14 = vpop.permute.xlu2 %1092 }
0x1c3d   :  { %v1095_v15 = vmul.f32 %v1093_v14, %v1088_v12 }
0x1c3f   :  { %1097 = vrot.lane.b32.xlu0 %v1095_v15, %s1410_s13 }
0x1c47   :  { %609 = vrot.lane.b32.xlu0 %v1615_v51, %s1415_s4  ;;  %v1124_v51 = vld [vmem:[%s1676_s5 + $0x18] sm:$0xff] }
0x1c48   :  { %1144 = vmatpush.msra.mxu0 %v1124_v51 }
0x1c4a   :  { %1145 = vmatpush.msra.mxu0 %v1123_v23 }
0x1c4c   :  { %1146 = vmatpush.msra.mxu0 %v1122_v24 }
0x1c4e   :  { %1147 = vmatpush.msra.mxu0 %v1121_v25 }
0x1cb1   :  { %v1098_v17 = vpop.permute.xlu0 %1097 }
0x1cb2   :  { %v1100_v18 = vadd.f32 %v1098_v17, %v1090_v16 }
0x1cb4   :  { %1302 = vtanh.f32 %v1100_v18 }
0x1cb9   :  { %v610_v19 = vpop.permute.xlu0 %609 }
0x1cba   :  { %v1303_v20 = vpop.eup %1302  ;;  %612 = vst.msk [vmem:[#allocation3] sm:$0x3] %vm78_vm0, %v610_v19 }
0x1cbb   :  { %1103 = vrot.lane.b32.xlu1 %v1303_v20, %s1414_s19 }
0x1cc3   :  { %1113 = vrot.lane.b32.xlu1 %v1100_v18, %s1415_s4 }
0x1d2d   :  { %v1104_v21 = vpop.permute.xlu1 %1103 }
0x1d2e   :  { %v1106_v22 = vmul.f32 %v1104_v21, %v1088_v12 }
0x1d30   :  { %1108 = vrot.lane.b32.xlu2 %v1106_v22, %s1410_s13 }
0x1d35   :  { %v1114_v48 = vpop.permute.xlu1 %1113 }
0x1d36   :  { %1116 = vst.msk [vmem:[#allocation3 + $0x2] sm:$0x3] %vm78_vm0, %v1114_v48 }
0x1d8a   :  { %v1109_v26 = vpop.permute.xlu2 %1108 }
0x1d8b   :  { %1111 = vst.msk [vmem:[#allocation2 + $0x2] sm:$0x3] %vm78_vm0, %v1109_v26 }
0x1d92   :  { %v1120_v27 = vld [vmem:[#allocation2 + $0x2] sm:$0x3] }
0x1d93   :  { %1193 = vmatmul.msk.f32.vlgmr.msra.gmra.mxu0 %vm179_vm1, %v1120_v27 }
0x1e10   :  { %v1149_v3 = vpop.f32.mrf.mxu0 }
0x1e11   :  { %v1150_v28 = vadd.f32 %v1207_v2, %v1149_v3 }
0x1e13   :  { %1153 = vst.msk [vmem:[#allocation12] sm:$0x3] %vm1152_vm3, %v1150_v28 }
0x1e14   :  { %1164 = dma.vmem_to_hbm [thread:$0]  %s1160_s16, 32, %s1162_s0, [#allocation8]  }
0x1e15   :  { %1404 = dma.done.wait [#allocation8], 32  }
0x1e16   :  { %1405 = vsyncadd [#allocation8], 4294967264 }
0x1e17   :  { %1169 = vsyncpa [#allocation7], 1 }
0x1e18   :  { %1170 = vsyncpa [#allocation10], 1 }
0x1e19   :  { %1171 = vsyncpa [#allocation8], 1 }

</bundles_post_ra>
